<compile_context>
chip_gen: v6e
topology: v6e:2x2x1
jax: 0.10.0
libtpu: 0.0.40
codegen_flags: <defaults>
</compile_context>

<pallas_src>
import functools
import numpy as np
import jax
import jax.numpy as jnp
from jax.experimental import pallas as pl
from jax.experimental.pallas import tpu as pltpu


# ----------------------------------------------------------------------------
# Fused kernel: conv3x3x3 (im2col matmul) + bias + ReLU + center-crop + action MLP
# for one batch element.
#   patchT_ref : (1, 108, S) bf16   im2col patches, row index = c*27 + (kd*9+kh*3+kw)
#   wc_ref     : (F, 108)    bf16   conv weight, col index matches patchT rows
#   bc_ref     : (F, 1)      f32
#   w1c_ref    : (27, fc, F) bf16   FC1 weight, slab k multiplies conv channel column
#   b1_ref     : (fc, 1)     f32
#   w2_ref     : (O, fc)     bf16
#   b2_ref     : (O, 1)      f32
#   feat_ref   : (1, F, S)   f32    channel-major conv output (lane dim = S)
#   act_ref    : (1, O, 1)   f32    action logits (column)
# ----------------------------------------------------------------------------
def _fused_kernel(patchT_ref, wc_ref, bc_ref, w1c_ref, b1_ref, w2_ref, b2_ref,
                  feat_ref, act_ref, *, crop_idx):
    # Conv as a single (F,108)@(108,S) MXU matmul, bf16 operands, f32 accumulate.
    y = jnp.dot(wc_ref[...], patchT_ref[0], preferred_element_type=jnp.float32)
    y = jnp.maximum(y + bc_ref[...], 0.0)            # (F, S) f32 after ReLU
    feat_ref[0] = y                                   # lane-dense channel-major store

    # Center 3x3x3 crop + FC1: h[j] = b1[j] + sum_{k,f} w1c[k,j,f] * y[f, crop_idx[k]]
    y_bf = y.astype(jnp.bfloat16)
    h = b1_ref[...]                                   # (fc, 1) f32
    for k, s in enumerate(crop_idx):                  # static unroll: 27 tiny MXU dots
        h = h + jnp.dot(w1c_ref[k], y_bf[:, s:s + 1],
                        preferred_element_type=jnp.float32)
    h = jnp.maximum(h, 0.0).astype(jnp.bfloat16)

    # FC2
    act = jnp.dot(w2_ref[...], h, preferred_element_type=jnp.float32) + b2_ref[...]
    act_ref[0] = act                                  # (O, 1)


def _crop_indices(OD, OH, OW):
    """Flat spatial indices (d*OH*OW + h*OW + w) of the center 3x3x3 crop."""
    d0, h0, w0 = OD // 2 - 1, OH // 2 - 1, OW // 2 - 1
    idx = []
    for a in range(3):
        for b in range(3):
            for c in range(3):
                idx.append((d0 + a) * (OH * OW) + (h0 + b) * OW + (w0 + c))
    return tuple(idx)


# ----------------------------------------------------------------------------
# Parameter pre-layout (run ONCE, outside the jitted per-call path).
# ----------------------------------------------------------------------------
def prepare_params(params):
    F, C = params["w_conv"].shape[:2]
    fc = params["b1"].shape[0]
    O = params["b2"].shape[0]
    wc = params["w_conv"].reshape(F, C * 27).astype(jnp.bfloat16)          # col = c*27+k
    bc = params["b_conv"].reshape(F, 1).astype(jnp.float32)
    # PyTorch x_act flatten is channel-major (f*27 + k): reorder w1 so slab k is (fc, F).
    w1c = jnp.transpose(params["w1"].reshape(fc, F, 27), (2, 0, 1)).astype(jnp.bfloat16)
    b1c = params["b1"].reshape(fc, 1).astype(jnp.float32)
    w2c = params["w2"].astype(jnp.bfloat16)                                # (O, fc)
    b2c = params["b2"].reshape(O, 1).astype(jnp.float32)
    return dict(wc=wc, bc=bc, w1c=w1c, b1c=b1c, w2c=w2c, b2c=b2c)


# ----------------------------------------------------------------------------
# Forward wrapper (jit this).
# ----------------------------------------------------------------------------
def seqnca3d_forward(obs, p):
    """obs: (B, D, H, W, C). Returns (action_out (B,O), features (B, F*OD*OH*OW))."""
    B, D, H, W, C = obs.shape
    OD, OH, OW = D - 2, H - 2, W - 2
    S = OD * OH * OW
    F = p["bc"].shape[0]
    fc = p["b1c"].shape[0]
    O = p["b2c"].shape[0]

    # Lane-dense im2col: patchT[b, c*27 + k, s] = obs[b, d+kd, h+kh, w+kw, c]
    obs_cf = jnp.transpose(obs, (0, 4, 1, 2, 3)).astype(jnp.bfloat16)      # (B,C,D,H,W)
    slabs = [obs_cf[:, :, kd:kd + OD, kh:kh + OH, kw:kw + OW].reshape(B, C, 1, S)
             for kd in range(3) for kh in range(3) for kw in range(3)]
    patchT = jnp.concatenate(slabs, axis=2).reshape(B, C * 27, S)          # (B,108,S)

    kernel = functools.partial(_fused_kernel, crop_idx=_crop_indices(OD, OH, OW))
    feat, act = pl.pallas_call(
        kernel,
        out_shape=(jax.ShapeDtypeStruct((B, F, S), jnp.float32),
                   jax.ShapeDtypeStruct((B, O, 1), jnp.float32)),
        grid=(B,),
        in_specs=[
            pl.BlockSpec((1, C * 27, S), lambda b: (b, 0, 0)),
            pl.BlockSpec((F, C * 27), lambda b: (0, 0)),
            pl.BlockSpec((F, 1), lambda b: (0, 0)),
            pl.BlockSpec((27, fc, F), lambda b: (0, 0, 0)),
            pl.BlockSpec((fc, 1), lambda b: (0, 0)),
            pl.BlockSpec((O, fc), lambda b: (0, 0)),
            pl.BlockSpec((O, 1), lambda b: (0, 0)),
        ],
        out_specs=(
            pl.BlockSpec((1, F, S), lambda b: (b, 0, 0)),
            pl.BlockSpec((1, O, 1), lambda b: (b, 0, 0)),
        ),
        compiler_params=pltpu.CompilerParams(dimension_semantics=("parallel",)),
    )(patchT, p["wc"], p["bc"], p["w1c"], p["b1c"], p["w2c"], p["b2c"])

    features = feat.reshape(B, F * S)     # already channel-major: free reshape
    action_out = act[:, :, 0]
    return action_out, features


# ----------------------------------------------------------------------------
# Deterministic parameter init (PyTorch-style shapes; synthetic values)
# ----------------------------------------------------------------------------
def init_params(key, in_channels, conv_filters, fc_size, num_outputs):
    ks = jax.random.split(key, 4)
    w_conv = jax.random.normal(ks[0], (conv_filters, in_channels, 3, 3, 3),
                               jnp.float32) / np.sqrt(in_channels * 27)
    b_conv = 0.01 * jax.random.normal(ks[1], (conv_filters,), jnp.float32)
    k1 = 3 * 3 * 3 * conv_filters
    w1 = jax.random.normal(ks[2], (fc_size, k1), jnp.float32) / np.sqrt(k1)
    b1 = jnp.zeros((fc_size,), jnp.float32)
    w2 = jax.random.normal(ks[3], (num_outputs, fc_size), jnp.float32) / np.sqrt(fc_size)
    b2 = jnp.zeros((num_outputs,), jnp.float32)
    return dict(w_conv=w_conv, b_conv=b_conv, w1=w1, b1=b1, w2=w2, b2=b2)


# ----------------------------------------------------------------------------
# Pure-JAX f32 reference (PyTorch semantics: permute to NCDHW, Conv3d, crop, MLP)
# ----------------------------------------------------------------------------
def reference_forward(obs, params):
    x = jnp.transpose(obs, (0, 4, 1, 2, 3)).astype(jnp.float32)   # NCDHW
    y = jax.lax.conv_general_dilated(
        x, params["w_conv"], window_strides=(1, 1, 1), padding="VALID",
        dimension_numbers=("NCDHW", "OIDHW", "NCDHW"))
    y = jnp.maximum(y + params["b_conv"][None, :, None, None, None], 0.0)
    B, _, OD, OH, OW = y.shape
    x_act = y[:, :, OD // 2 - 1:OD // 2 + 2,
                    OH // 2 - 1:OH // 2 + 2,
                    OW // 2 - 1:OW // 2 + 2].reshape(B, -1)
    feats = y.reshape(B, -1)
    h = jnp.maximum(x_act @ params["w1"].T + params["b1"], 0.0)
    return h @ params["w2"].T + params["b2"], feats


if __name__ == "__main__":
    key = jax.random.PRNGKey(0)
    # Small shapes: obs_space.shape = (D, H, W, C) = (8, 8, 8, 4), batch = 2.
    B, D, H, W, C = 2, 8, 8, 8, 4
    conv_filters, fc_size, num_outputs = 64, 64, 8

    k_obs, k_par = jax.random.split(key)
    obs = jax.random.normal(k_obs, (B, D, H, W, C), jnp.float32)
    params = init_params(k_par, C, conv_filters, fc_size, num_outputs)
    prepped = prepare_params(params)   # weight re-layouts hoisted out of the forward

    fwd = jax.jit(seqnca3d_forward)
    action_out, features = fwd(obs, prepped)
    action_out = jax.block_until_ready(action_out)
    features = jax.block_until_ready(features)

    assert action_out.shape == (B, num_outputs)
    assert features.shape == (B, conv_filters * (D - 2) * (H - 2) * (W - 2))

    # Check vs. f32 reference. Operands are bf16 (f32 accumulate): expected abs error
    # is ~5e-3 on O(1) values, while any kernel-offset ordering bug would be O(1).
    ref_out, ref_feats = reference_forward(obs, params)
    np.testing.assert_allclose(np.asarray(action_out), np.asarray(ref_out),
                               rtol=5e-2, atol=5e-2)
    np.testing.assert_allclose(np.asarray(features), np.asarray(ref_feats),
                               rtol=5e-2, atol=5e-2)

    print("KERNEL_OK")
</pallas_src>

<mosaic_0001>
module attributes {stable_mosaic.version = 11 : i64} {
  func.func @_fused_kernel(%arg0: i32, %arg1: memref<1x108x216xbf16, #tpu.memory_space<vmem>>, %arg2: memref<64x108xbf16, #tpu.memory_space<vmem>>, %arg3: memref<64x1xf32, #tpu.memory_space<vmem>>, %arg4: memref<27x64x64xbf16, #tpu.memory_space<vmem>>, %arg5: memref<64x1xf32, #tpu.memory_space<vmem>>, %arg6: memref<8x64xbf16, #tpu.memory_space<vmem>>, %arg7: memref<8x1xf32, #tpu.memory_space<vmem>>, %arg8: memref<1x64x216xf32, #tpu.memory_space<vmem>>, %arg9: memref<1x8x1xf32, #tpu.memory_space<vmem>>) attributes {dimension_semantics = [#tpu.dimension_semantics<parallel>], iteration_bounds = array<i64: 2>, scalar_prefetch = 0 : i64, scratch_operands = 0 : i64, tpu.core_type = #tpu.core_type<tc>, window_params = [{transform_indices = @transform_0, window_bounds = array<i64: 1, 108, 216>}, {pipeline_mode = #tpu.pipeline_mode<synchronous>, transform_indices = @transform_1, window_bounds = array<i64: 64, 108>}, {pipeline_mode = #tpu.pipeline_mode<synchronous>, transform_indices = @transform_2, window_bounds = array<i64: 64, 1>}, {pipeline_mode = #tpu.pipeline_mode<synchronous>, transform_indices = @transform_3, window_bounds = array<i64: 27, 64, 64>}, {pipeline_mode = #tpu.pipeline_mode<synchronous>, transform_indices = @transform_4, window_bounds = array<i64: 64, 1>}, {pipeline_mode = #tpu.pipeline_mode<synchronous>, transform_indices = @transform_5, window_bounds = array<i64: 8, 64>}, {pipeline_mode = #tpu.pipeline_mode<synchronous>, transform_indices = @transform_6, window_bounds = array<i64: 8, 1>}, {transform_indices = @transform_7, window_bounds = array<i64: 1, 64, 216>}, {transform_indices = @transform_8, window_bounds = array<i64: 1, 8, 1>}]} {
    %c0 = arith.constant 0 : index
    %c0_0 = arith.constant 0 : index
    %0 = vector.load %arg2[%c0, %c0_0] : memref<64x108xbf16, #tpu.memory_space<vmem>>, vector<64x108xbf16>
    %c0_1 = arith.constant 0 : index
    %c0_2 = arith.constant 0 : index
    %c0_3 = arith.constant 0 : index
    %1 = vector.load %arg1[%c0_1, %c0_2, %c0_3] : memref<1x108x216xbf16, #tpu.memory_space<vmem>>, vector<1x108x216xbf16>
    %2 = vector.shape_cast %1 : vector<1x108x216xbf16> to vector<108x216xbf16>
    %cst = arith.constant dense<0.000000e+00> : vector<64x216xf32>
    %3 = tpu.matmul %0, %2, %cst {dimension_numbers = #tpu.dot_dimension_numbers<[1], [0], [0], [1], [0, 0, 1, 1], [], []>} : vector<64x108xbf16>, vector<108x216xbf16>, vector<64x216xf32> -> vector<64x216xf32>
    %c0_4 = arith.constant 0 : index
    %c0_5 = arith.constant 0 : index
    %4 = vector.load %arg3[%c0_4, %c0_5] : memref<64x1xf32, #tpu.memory_space<vmem>>, vector<64x1xf32>
    %5 = vector.broadcast %4 : vector<64x1xf32> to vector<64x216xf32>
    %6 = arith.addf %3, %5 : vector<64x216xf32>
    %cst_6 = arith.constant 0.000000e+00 : f32
    %7 = vector.broadcast %cst_6 : f32 to vector<64x216xf32>
    %8 = arith.maximumf %6, %7 : vector<64x216xf32>
    %c0_7 = arith.constant 0 : index
    %c0_8 = arith.constant 0 : index
    %c0_9 = arith.constant 0 : index
    %9 = vector.load %arg8[%c0_7, %c0_8, %c0_9] : memref<1x64x216xf32, #tpu.memory_space<vmem>>, vector<1x64x216xf32>
    %10 = vector.shape_cast %9 : vector<1x64x216xf32> to vector<64x216xf32>
    %11 = vector.shape_cast %8 : vector<64x216xf32> to vector<1x64x216xf32>
    tpu.vector_store %arg8[%c0_7, %c0_8, %c0_9], %11 {strides = array<i32>} : memref<1x64x216xf32, #tpu.memory_space<vmem>>, vector<1x64x216xf32>,
    %12 = arith.truncf %8 : vector<64x216xf32> to vector<64x216xbf16>
    %c0_10 = arith.constant 0 : index
    %c0_11 = arith.constant 0 : index
    %13 = vector.load %arg5[%c0_10, %c0_11] : memref<64x1xf32, #tpu.memory_space<vmem>>, vector<64x1xf32>
    %c0_12 = arith.constant 0 : index
    %c0_13 = arith.constant 0 : index
    %c0_14 = arith.constant 0 : index
    %14 = vector.load %arg4[%c0_12, %c0_13, %c0_14] : memref<27x64x64xbf16, #tpu.memory_space<vmem>>, vector<1x64x64xbf16>
    %15 = vector.shape_cast %14 : vector<1x64x64xbf16> to vector<64x64xbf16>
    %16 = vector.extract_strided_slice %12 {offsets = [0, 86], sizes = [64, 1], strides = [1, 1]} : vector<64x216xbf16> to vector<64x1xbf16>
    %cst_15 = arith.constant dense<0.000000e+00> : vector<64x1xf32>
    %17 = tpu.matmul %15, %16, %cst_15 {dimension_numbers = #tpu.dot_dimension_numbers<[1], [0], [0], [1], [0, 0, 1, 1], [], []>} : vector<64x64xbf16>, vector<64x1xbf16>, vector<64x1xf32> -> vector<64x1xf32>
    %18 = arith.addf %13, %17 : vector<64x1xf32>
    %c1 = arith.constant 1 : index
    %c0_16 = arith.constant 0 : index
    %c0_17 = arith.constant 0 : index
    %19 = vector.load %arg4[%c1, %c0_16, %c0_17] : memref<27x64x64xbf16, #tpu.memory_space<vmem>>, vector<1x64x64xbf16>
    %20 = vector.shape_cast %19 : vector<1x64x64xbf16> to vector<64x64xbf16>
    %21 = vector.extract_strided_slice %12 {offsets = [0, 87], sizes = [64, 1], strides = [1, 1]} : vector<64x216xbf16> to vector<64x1xbf16>
    %cst_18 = arith.constant dense<0.000000e+00> : vector<64x1xf32>
    %22 = tpu.matmul %20, %21, %cst_18 {dimension_numbers = #tpu.dot_dimension_numbers<[1], [0], [0], [1], [0, 0, 1, 1], [], []>} : vector<64x64xbf16>, vector<64x1xbf16>, vector<64x1xf32> -> vector<64x1xf32>
    %23 = arith.addf %18, %22 : vector<64x1xf32>
    %c2 = arith.constant 2 : index
    %c0_19 = arith.constant 0 : index
    %c0_20 = arith.constant 0 : index
    %24 = vector.load %arg4[%c2, %c0_19, %c0_20] : memref<27x64x64xbf16, #tpu.memory_space<vmem>>, vector<1x64x64xbf16>
    %25 = vector.shape_cast %24 : vector<1x64x64xbf16> to vector<64x64xbf16>
    %26 = vector.extract_strided_slice %12 {offsets = [0, 88], sizes = [64, 1], strides = [1, 1]} : vector<64x216xbf16> to vector<64x1xbf16>
    %cst_21 = arith.constant dense<0.000000e+00> : vector<64x1xf32>
    %27 = tpu.matmul %25, %26, %cst_21 {dimension_numbers = #tpu.dot_dimension_numbers<[1], [0], [0], [1], [0, 0, 1, 1], [], []>} : vector<64x64xbf16>, vector<64x1xbf16>, vector<64x1xf32> -> vector<64x1xf32>
    %28 = arith.addf %23, %27 : vector<64x1xf32>
    %c3 = arith.constant 3 : index
    %c0_22 = arith.constant 0 : index
    %c0_23 = arith.constant 0 : index
    %29 = vector.load %arg4[%c3, %c0_22, %c0_23] : memref<27x64x64xbf16, #tpu.memory_space<vmem>>, vector<1x64x64xbf16>
    %30 = vector.shape_cast %29 : vector<1x64x64xbf16> to vector<64x64xbf16>
    %31 = vector.extract_strided_slice %12 {offsets = [0, 92], sizes = [64, 1], strides = [1, 1]} : vector<64x216xbf16> to vector<64x1xbf16>
    %cst_24 = arith.constant dense<0.000000e+00> : vector<64x1xf32>
    %32 = tpu.matmul %30, %31, %cst_24 {dimension_numbers = #tpu.dot_dimension_numbers<[1], [0], [0], [1], [0, 0, 1, 1], [], []>} : vector<64x64xbf16>, vector<64x1xbf16>, vector<64x1xf32> -> vector<64x1xf32>
    %33 = arith.addf %28, %32 : vector<64x1xf32>
    %c4 = arith.constant 4 : index
    %c0_25 = arith.constant 0 : index
    %c0_26 = arith.constant 0 : index
    %34 = vector.load %arg4[%c4, %c0_25, %c0_26] : memref<27x64x64xbf16, #tpu.memory_space<vmem>>, vector<1x64x64xbf16>
    %35 = vector.shape_cast %34 : vector<1x64x64xbf16> to vector<64x64xbf16>
    %36 = vector.extract_strided_slice %12 {offsets = [0, 93], sizes = [64, 1], strides = [1, 1]} : vector<64x216xbf16> to vector<64x1xbf16>
    %cst_27 = arith.constant dense<0.000000e+00> : vector<64x1xf32>
    %37 = tpu.matmul %35, %36, %cst_27 {dimension_numbers = #tpu.dot_dimension_numbers<[1], [0], [0], [1], [0, 0, 1, 1], [], []>} : vector<64x64xbf16>, vector<64x1xbf16>, vector<64x1xf32> -> vector<64x1xf32>
    %38 = arith.addf %33, %37 : vector<64x1xf32>
    %c5 = arith.constant 5 : index
    %c0_28 = arith.constant 0 : index
    %c0_29 = arith.constant 0 : index
    %39 = vector.load %arg4[%c5, %c0_28, %c0_29] : memref<27x64x64xbf16, #tpu.memory_space<vmem>>, vector<1x64x64xbf16>
    %40 = vector.shape_cast %39 : vector<1x64x64xbf16> to vector<64x64xbf16>
    %41 = vector.extract_strided_slice %12 {offsets = [0, 94], sizes = [64, 1], strides = [1, 1]} : vector<64x216xbf16> to vector<64x1xbf16>
    %cst_30 = arith.constant dense<0.000000e+00> : vector<64x1xf32>
    %42 = tpu.matmul %40, %41, %cst_30 {dimension_numbers = #tpu.dot_dimension_numbers<[1], [0], [0], [1], [0, 0, 1, 1], [], []>} : vector<64x64xbf16>, vector<64x1xbf16>, vector<64x1xf32> -> vector<64x1xf32>
    %43 = arith.addf %38, %42 : vector<64x1xf32>
    %c6 = arith.constant 6 : index
    %c0_31 = arith.constant 0 : index
    %c0_32 = arith.constant 0 : index
    %44 = vector.load %arg4[%c6, %c0_31, %c0_32] : memref<27x64x64xbf16, #tpu.memory_space<vmem>>, vector<1x64x64xbf16>
    %45 = vector.shape_cast %44 : vector<1x64x64xbf16> to vector<64x64xbf16>
    %46 = vector.extract_strided_slice %12 {offsets = [0, 98], sizes = [64, 1], strides = [1, 1]} : vector<64x216xbf16> to vector<64x1xbf16>
    %cst_33 = arith.constant dense<0.000000e+00> : vector<64x1xf32>
    %47 = tpu.matmul %45, %46, %cst_33 {dimension_numbers = #tpu.dot_dimension_numbers<[1], [0], [0], [1], [0, 0, 1, 1], [], []>} : vector<64x64xbf16>, vector<64x1xbf16>, vector<64x1xf32> -> vector<64x1xf32>
    %48 = arith.addf %43, %47 : vector<64x1xf32>
    %c7 = arith.constant 7 : index
    %c0_34 = arith.constant 0 : index
    %c0_35 = arith.constant 0 : index
    %49 = vector.load %arg4[%c7, %c0_34, %c0_35] : memref<27x64x64xbf16, #tpu.memory_space<vmem>>, vector<1x64x64xbf16>
    %50 = vector.shape_cast %49 : vector<1x64x64xbf16> to vector<64x64xbf16>
    %51 = vector.extract_strided_slice %12 {offsets = [0, 99], sizes = [64, 1], strides = [1, 1]} : vector<64x216xbf16> to vector<64x1xbf16>
    %cst_36 = arith.constant dense<0.000000e+00> : vector<64x1xf32>
    %52 = tpu.matmul %50, %51, %cst_36 {dimension_numbers = #tpu.dot_dimension_numbers<[1], [0], [0], [1], [0, 0, 1, 1], [], []>} : vector<64x64xbf16>, vector<64x1xbf16>, vector<64x1xf32> -> vector<64x1xf32>
    %53 = arith.addf %48, %52 : vector<64x1xf32>
    %c8 = arith.constant 8 : index
    %c0_37 = arith.constant 0 : index
    %c0_38 = arith.constant 0 : index
    %54 = vector.load %arg4[%c8, %c0_37, %c0_38] : memref<27x64x64xbf16, #tpu.memory_space<vmem>>, vector<1x64x64xbf16>
    %55 = vector.shape_cast %54 : vector<1x64x64xbf16> to vector<64x64xbf16>
    %56 = vector.extract_strided_slice %12 {offsets = [0, 100], sizes = [64, 1], strides = [1, 1]} : vector<64x216xbf16> to vector<64x1xbf16>
    %cst_39 = arith.constant dense<0.000000e+00> : vector<64x1xf32>
    %57 = tpu.matmul %55, %56, %cst_39 {dimension_numbers = #tpu.dot_dimension_numbers<[1], [0], [0], [1], [0, 0, 1, 1], [], []>} : vector<64x64xbf16>, vector<64x1xbf16>, vector<64x1xf32> -> vector<64x1xf32>
    %58 = arith.addf %53, %57 : vector<64x1xf32>
    %c9 = arith.constant 9 : index
    %c0_40 = arith.constant 0 : index
    %c0_41 = arith.constant 0 : index
    %59 = vector.load %arg4[%c9, %c0_40, %c0_41] : memref<27x64x64xbf16, #tpu.memory_space<vmem>>, vector<1x64x64xbf16>
    %60 = vector.shape_cast %59 : vector<1x64x64xbf16> to vector<64x64xbf16>
    %61 = vector.extract_strided_slice %12 {offsets = [0, 122], sizes = [64, 1], strides = [1, 1]} : vector<64x216xbf16> to vector<64x1xbf16>
    %cst_42 = arith.constant dense<0.000000e+00> : vector<64x1xf32>
    %62 = tpu.matmul %60, %61, %cst_42 {dimension_numbers = #tpu.dot_dimension_numbers<[1], [0], [0], [1], [0, 0, 1, 1], [], []>} : vector<64x64xbf16>, vector<64x1xbf16>, vector<64x1xf32> -> vector<64x1xf32>
    %63 = arith.addf %58, %62 : vector<64x1xf32>
    %c10 = arith.constant 10 : index
    %c0_43 = arith.constant 0 : index
    %c0_44 = arith.constant 0 : index
    %64 = vector.load %arg4[%c10, %c0_43, %c0_44] : memref<27x64x64xbf16, #tpu.memory_space<vmem>>, vector<1x64x64xbf16>
    %65 = vector.shape_cast %64 : vector<1x64x64xbf16> to vector<64x64xbf16>
    %66 = vector.extract_strided_slice %12 {offsets = [0, 123], sizes = [64, 1], strides = [1, 1]} : vector<64x216xbf16> to vector<64x1xbf16>
    %cst_45 = arith.constant dense<0.000000e+00> : vector<64x1xf32>
    %67 = tpu.matmul %65, %66, %cst_45 {dimension_numbers = #tpu.dot_dimension_numbers<[1], [0], [0], [1], [0, 0, 1, 1], [], []>} : vector<64x64xbf16>, vector<64x1xbf16>, vector<64x1xf32> -> vector<64x1xf32>
    %68 = arith.addf %63, %67 : vector<64x1xf32>
    %c11 = arith.constant 11 : index
    %c0_46 = arith.constant 0 : index
    %c0_47 = arith.constant 0 : index
    %69 = vector.load %arg4[%c11, %c0_46, %c0_47] : memref<27x64x64xbf16, #tpu.memory_space<vmem>>, vector<1x64x64xbf16>
    %70 = vector.shape_cast %69 : vector<1x64x64xbf16> to vector<64x64xbf16>
    %71 = vector.extract_strided_slice %12 {offsets = [0, 124], sizes = [64, 1], strides = [1, 1]} : vector<64x216xbf16> to vector<64x1xbf16>
    %cst_48 = arith.constant dense<0.000000e+00> : vector<64x1xf32>
    %72 = tpu.matmul %70, %71, %cst_48 {dimension_numbers = #tpu.dot_dimension_numbers<[1], [0], [0], [1], [0, 0, 1, 1], [], []>} : vector<64x64xbf16>, vector<64x1xbf16>, vector<64x1xf32> -> vector<64x1xf32>
    %73 = arith.addf %68, %72 : vector<64x1xf32>
    %c12 = arith.constant 12 : index
    %c0_49 = arith.constant 0 : index
    %c0_50 = arith.constant 0 : index
    %74 = vector.load %arg4[%c12, %c0_49, %c0_50] : memref<27x64x64xbf16, #tpu.memory_space<vmem>>, vector<1x64x64xbf16>
    %75 = vector.shape_cast %74 : vector<1x64x64xbf16> to vector<64x64xbf16>
    %76 = vector.extract_strided_slice %12 {offsets = [0, 128], sizes = [64, 1], strides = [1, 1]} : vector<64x216xbf16> to vector<64x1xbf16>
    %cst_51 = arith.constant dense<0.000000e+00> : vector<64x1xf32>
    %77 = tpu.matmul %75, %76, %cst_51 {dimension_numbers = #tpu.dot_dimension_numbers<[1], [0], [0], [1], [0, 0, 1, 1], [], []>} : vector<64x64xbf16>, vector<64x1xbf16>, vector<64x1xf32> -> vector<64x1xf32>
    %78 = arith.addf %73, %77 : vector<64x1xf32>
    %c13 = arith.constant 13 : index
    %c0_52 = arith.constant 0 : index
    %c0_53 = arith.constant 0 : index
    %79 = vector.load %arg4[%c13, %c0_52, %c0_53] : memref<27x64x64xbf16, #tpu.memory_space<vmem>>, vector<1x64x64xbf16>
    %80 = vector.shape_cast %79 : vector<1x64x64xbf16> to vector<64x64xbf16>
    %81 = vector.extract_strided_slice %12 {offsets = [0, 129], sizes = [64, 1], strides = [1, 1]} : vector<64x216xbf16> to vector<64x1xbf16>
    %cst_54 = arith.constant dense<0.000000e+00> : vector<64x1xf32>
    %82 = tpu.matmul %80, %81, %cst_54 {dimension_numbers = #tpu.dot_dimension_numbers<[1], [0], [0], [1], [0, 0, 1, 1], [], []>} : vector<64x64xbf16>, vector<64x1xbf16>, vector<64x1xf32> -> vector<64x1xf32>
    %83 = arith.addf %78, %82 : vector<64x1xf32>
    %c14 = arith.constant 14 : index
    %c0_55 = arith.constant 0 : index
    %c0_56 = arith.constant 0 : index
    %84 = vector.load %arg4[%c14, %c0_55, %c0_56] : memref<27x64x64xbf16, #tpu.memory_space<vmem>>, vector<1x64x64xbf16>
    %85 = vector.shape_cast %84 : vector<1x64x64xbf16> to vector<64x64xbf16>
    %86 = vector.extract_strided_slice %12 {offsets = [0, 130], sizes = [64, 1], strides = [1, 1]} : vector<64x216xbf16> to vector<64x1xbf16>
    %cst_57 = arith.constant dense<0.000000e+00> : vector<64x1xf32>
    %87 = tpu.matmul %85, %86, %cst_57 {dimension_numbers = #tpu.dot_dimension_numbers<[1], [0], [0], [1], [0, 0, 1, 1], [], []>} : vector<64x64xbf16>, vector<64x1xbf16>, vector<64x1xf32> -> vector<64x1xf32>
    %88 = arith.addf %83, %87 : vector<64x1xf32>
    %c15 = arith.constant 15 : index
    %c0_58 = arith.constant 0 : index
    %c0_59 = arith.constant 0 : index
    %89 = vector.load %arg4[%c15, %c0_58, %c0_59] : memref<27x64x64xbf16, #tpu.memory_space<vmem>>, vector<1x64x64xbf16>
    %90 = vector.shape_cast %89 : vector<1x64x64xbf16> to vector<64x64xbf16>
    %91 = vector.extract_strided_slice %12 {offsets = [0, 134], sizes = [64, 1], strides = [1, 1]} : vector<64x216xbf16> to vector<64x1xbf16>
    %cst_60 = arith.constant dense<0.000000e+00> : vector<64x1xf32>
    %92 = tpu.matmul %90, %91, %cst_60 {dimension_numbers = #tpu.dot_dimension_numbers<[1], [0], [0], [1], [0, 0, 1, 1], [], []>} : vector<64x64xbf16>, vector<64x1xbf16>, vector<64x1xf32> -> vector<64x1xf32>
    %93 = arith.addf %88, %92 : vector<64x1xf32>
    %c16 = arith.constant 16 : index
    %c0_61 = arith.constant 0 : index
    %c0_62 = arith.constant 0 : index
    %94 = vector.load %arg4[%c16, %c0_61, %c0_62] : memref<27x64x64xbf16, #tpu.memory_space<vmem>>, vector<1x64x64xbf16>
    %95 = vector.shape_cast %94 : vector<1x64x64xbf16> to vector<64x64xbf16>
    %96 = vector.extract_strided_slice %12 {offsets = [0, 135], sizes = [64, 1], strides = [1, 1]} : vector<64x216xbf16> to vector<64x1xbf16>
    %cst_63 = arith.constant dense<0.000000e+00> : vector<64x1xf32>
    %97 = tpu.matmul %95, %96, %cst_63 {dimension_numbers = #tpu.dot_dimension_numbers<[1], [0], [0], [1], [0, 0, 1, 1], [], []>} : vector<64x64xbf16>, vector<64x1xbf16>, vector<64x1xf32> -> vector<64x1xf32>
    %98 = arith.addf %93, %97 : vector<64x1xf32>
    %c17 = arith.constant 17 : index
    %c0_64 = arith.constant 0 : index
    %c0_65 = arith.constant 0 : index
    %99 = vector.load %arg4[%c17, %c0_64, %c0_65] : memref<27x64x64xbf16, #tpu.memory_space<vmem>>, vector<1x64x64xbf16>
    %100 = vector.shape_cast %99 : vector<1x64x64xbf16> to vector<64x64xbf16>
    %101 = vector.extract_strided_slice %12 {offsets = [0, 136], sizes = [64, 1], strides = [1, 1]} : vector<64x216xbf16> to vector<64x1xbf16>
    %cst_66 = arith.constant dense<0.000000e+00> : vector<64x1xf32>
    %102 = tpu.matmul %100, %101, %cst_66 {dimension_numbers = #tpu.dot_dimension_numbers<[1], [0], [0], [1], [0, 0, 1, 1], [], []>} : vector<64x64xbf16>, vector<64x1xbf16>, vector<64x1xf32> -> vector<64x1xf32>
    %103 = arith.addf %98, %102 : vector<64x1xf32>
    %c18 = arith.constant 18 : index
    %c0_67 = arith.constant 0 : index
    %c0_68 = arith.constant 0 : index
    %104 = vector.load %arg4[%c18, %c0_67, %c0_68] : memref<27x64x64xbf16, #tpu.memory_space<vmem>>, vector<1x64x64xbf16>
    %105 = vector.shape_cast %104 : vector<1x64x64xbf16> to vector<64x64xbf16>
    %106 = vector.extract_strided_slice %12 {offsets = [0, 158], sizes = [64, 1], strides = [1, 1]} : vector<64x216xbf16> to vector<64x1xbf16>
    %cst_69 = arith.constant dense<0.000000e+00> : vector<64x1xf32>
    %107 = tpu.matmul %105, %106, %cst_69 {dimension_numbers = #tpu.dot_dimension_numbers<[1], [0], [0], [1], [0, 0, 1, 1], [], []>} : vector<64x64xbf16>, vector<64x1xbf16>, vector<64x1xf32> -> vector<64x1xf32>
    %108 = arith.addf %103, %107 : vector<64x1xf32>
    %c19 = arith.constant 19 : index
    %c0_70 = arith.constant 0 : index
    %c0_71 = arith.constant 0 : index
    %109 = vector.load %arg4[%c19, %c0_70, %c0_71] : memref<27x64x64xbf16, #tpu.memory_space<vmem>>, vector<1x64x64xbf16>
    %110 = vector.shape_cast %109 : vector<1x64x64xbf16> to vector<64x64xbf16>
    %111 = vector.extract_strided_slice %12 {offsets = [0, 159], sizes = [64, 1], strides = [1, 1]} : vector<64x216xbf16> to vector<64x1xbf16>
    %cst_72 = arith.constant dense<0.000000e+00> : vector<64x1xf32>
    %112 = tpu.matmul %110, %111, %cst_72 {dimension_numbers = #tpu.dot_dimension_numbers<[1], [0], [0], [1], [0, 0, 1, 1], [], []>} : vector<64x64xbf16>, vector<64x1xbf16>, vector<64x1xf32> -> vector<64x1xf32>
    %113 = arith.addf %108, %112 : vector<64x1xf32>
    %c20 = arith.constant 20 : index
    %c0_73 = arith.constant 0 : index
    %c0_74 = arith.constant 0 : index
    %114 = vector.load %arg4[%c20, %c0_73, %c0_74] : memref<27x64x64xbf16, #tpu.memory_space<vmem>>, vector<1x64x64xbf16>
    %115 = vector.shape_cast %114 : vector<1x64x64xbf16> to vector<64x64xbf16>
    %116 = vector.extract_strided_slice %12 {offsets = [0, 160], sizes = [64, 1], strides = [1, 1]} : vector<64x216xbf16> to vector<64x1xbf16>
    %cst_75 = arith.constant dense<0.000000e+00> : vector<64x1xf32>
    %117 = tpu.matmul %115, %116, %cst_75 {dimension_numbers = #tpu.dot_dimension_numbers<[1], [0], [0], [1], [0, 0, 1, 1], [], []>} : vector<64x64xbf16>, vector<64x1xbf16>, vector<64x1xf32> -> vector<64x1xf32>
    %118 = arith.addf %113, %117 : vector<64x1xf32>
    %c21 = arith.constant 21 : index
    %c0_76 = arith.constant 0 : index
    %c0_77 = arith.constant 0 : index
    %119 = vector.load %arg4[%c21, %c0_76, %c0_77] : memref<27x64x64xbf16, #tpu.memory_space<vmem>>, vector<1x64x64xbf16>
    %120 = vector.shape_cast %119 : vector<1x64x64xbf16> to vector<64x64xbf16>
    %121 = vector.extract_strided_slice %12 {offsets = [0, 164], sizes = [64, 1], strides = [1, 1]} : vector<64x216xbf16> to vector<64x1xbf16>
    %cst_78 = arith.constant dense<0.000000e+00> : vector<64x1xf32>
    %122 = tpu.matmul %120, %121, %cst_78 {dimension_numbers = #tpu.dot_dimension_numbers<[1], [0], [0], [1], [0, 0, 1, 1], [], []>} : vector<64x64xbf16>, vector<64x1xbf16>, vector<64x1xf32> -> vector<64x1xf32>
    %123 = arith.addf %118, %122 : vector<64x1xf32>
    %c22 = arith.constant 22 : index
    %c0_79 = arith.constant 0 : index
    %c0_80 = arith.constant 0 : index
    %124 = vector.load %arg4[%c22, %c0_79, %c0_80] : memref<27x64x64xbf16, #tpu.memory_space<vmem>>, vector<1x64x64xbf16>
    %125 = vector.shape_cast %124 : vector<1x64x64xbf16> to vector<64x64xbf16>
    %126 = vector.extract_strided_slice %12 {offsets = [0, 165], sizes = [64, 1], strides = [1, 1]} : vector<64x216xbf16> to vector<64x1xbf16>
    %cst_81 = arith.constant dense<0.000000e+00> : vector<64x1xf32>
    %127 = tpu.matmul %125, %126, %cst_81 {dimension_numbers = #tpu.dot_dimension_numbers<[1], [0], [0], [1], [0, 0, 1, 1], [], []>} : vector<64x64xbf16>, vector<64x1xbf16>, vector<64x1xf32> -> vector<64x1xf32>
    %128 = arith.addf %123, %127 : vector<64x1xf32>
    %c23 = arith.constant 23 : index
    %c0_82 = arith.constant 0 : index
    %c0_83 = arith.constant 0 : index
    %129 = vector.load %arg4[%c23, %c0_82, %c0_83] : memref<27x64x64xbf16, #tpu.memory_space<vmem>>, vector<1x64x64xbf16>
    %130 = vector.shape_cast %129 : vector<1x64x64xbf16> to vector<64x64xbf16>
    %131 = vector.extract_strided_slice %12 {offsets = [0, 166], sizes = [64, 1], strides = [1, 1]} : vector<64x216xbf16> to vector<64x1xbf16>
    %cst_84 = arith.constant dense<0.000000e+00> : vector<64x1xf32>
    %132 = tpu.matmul %130, %131, %cst_84 {dimension_numbers = #tpu.dot_dimension_numbers<[1], [0], [0], [1], [0, 0, 1, 1], [], []>} : vector<64x64xbf16>, vector<64x1xbf16>, vector<64x1xf32> -> vector<64x1xf32>
    %133 = arith.addf %128, %132 : vector<64x1xf32>
    %c24 = arith.constant 24 : index
    %c0_85 = arith.constant 0 : index
    %c0_86 = arith.constant 0 : index
    %134 = vector.load %arg4[%c24, %c0_85, %c0_86] : memref<27x64x64xbf16, #tpu.memory_space<vmem>>, vector<1x64x64xbf16>
    %135 = vector.shape_cast %134 : vector<1x64x64xbf16> to vector<64x64xbf16>
    %136 = vector.extract_strided_slice %12 {offsets = [0, 170], sizes = [64, 1], strides = [1, 1]} : vector<64x216xbf16> to vector<64x1xbf16>
    %cst_87 = arith.constant dense<0.000000e+00> : vector<64x1xf32>
    %137 = tpu.matmul %135, %136, %cst_87 {dimension_numbers = #tpu.dot_dimension_numbers<[1], [0], [0], [1], [0, 0, 1, 1], [], []>} : vector<64x64xbf16>, vector<64x1xbf16>, vector<64x1xf32> -> vector<64x1xf32>
    %138 = arith.addf %133, %137 : vector<64x1xf32>
    %c25 = arith.constant 25 : index
    %c0_88 = arith.constant 0 : index
    %c0_89 = arith.constant 0 : index
    %139 = vector.load %arg4[%c25, %c0_88, %c0_89] : memref<27x64x64xbf16, #tpu.memory_space<vmem>>, vector<1x64x64xbf16>
    %140 = vector.shape_cast %139 : vector<1x64x64xbf16> to vector<64x64xbf16>
    %141 = vector.extract_strided_slice %12 {offsets = [0, 171], sizes = [64, 1], strides = [1, 1]} : vector<64x216xbf16> to vector<64x1xbf16>
    %cst_90 = arith.constant dense<0.000000e+00> : vector<64x1xf32>
    %142 = tpu.matmul %140, %141, %cst_90 {dimension_numbers = #tpu.dot_dimension_numbers<[1], [0], [0], [1], [0, 0, 1, 1], [], []>} : vector<64x64xbf16>, vector<64x1xbf16>, vector<64x1xf32> -> vector<64x1xf32>
    %143 = arith.addf %138, %142 : vector<64x1xf32>
    %c26 = arith.constant 26 : index
    %c0_91 = arith.constant 0 : index
    %c0_92 = arith.constant 0 : index
    %144 = vector.load %arg4[%c26, %c0_91, %c0_92] : memref<27x64x64xbf16, #tpu.memory_space<vmem>>, vector<1x64x64xbf16>
    %145 = vector.shape_cast %144 : vector<1x64x64xbf16> to vector<64x64xbf16>
    %146 = vector.extract_strided_slice %12 {offsets = [0, 172], sizes = [64, 1], strides = [1, 1]} : vector<64x216xbf16> to vector<64x1xbf16>
    %cst_93 = arith.constant dense<0.000000e+00> : vector<64x1xf32>
    %147 = tpu.matmul %145, %146, %cst_93 {dimension_numbers = #tpu.dot_dimension_numbers<[1], [0], [0], [1], [0, 0, 1, 1], [], []>} : vector<64x64xbf16>, vector<64x1xbf16>, vector<64x1xf32> -> vector<64x1xf32>
    %148 = arith.addf %143, %147 : vector<64x1xf32>
    %cst_94 = arith.constant 0.000000e+00 : f32
    %149 = vector.broadcast %cst_94 : f32 to vector<64x1xf32>
    %150 = arith.maximumf %148, %149 : vector<64x1xf32>
    %151 = arith.truncf %150 : vector<64x1xf32> to vector<64x1xbf16>
    %c0_95 = arith.constant 0 : index
    %c0_96 = arith.constant 0 : index
    %152 = vector.load %arg6[%c0_95, %c0_96] : memref<8x64xbf16, #tpu.memory_space<vmem>>, vector<8x64xbf16>
    %cst_97 = arith.constant dense<0.000000e+00> : vector<8x1xf32>
    %153 = tpu.matmul %152, %151, %cst_97 {dimension_numbers = #tpu.dot_dimension_numbers<[1], [0], [0], [1], [0, 0, 1, 1], [], []>} : vector<8x64xbf16>, vector<64x1xbf16>, vector<8x1xf32> -> vector<8x1xf32>
    %c0_98 = arith.constant 0 : index
    %c0_99 = arith.constant 0 : index
    %154 = vector.load %arg7[%c0_98, %c0_99] : memref<8x1xf32, #tpu.memory_space<vmem>>, vector<8x1xf32>
    %155 = arith.addf %153, %154 : vector<8x1xf32>
    %c0_100 = arith.constant 0 : index
    %c0_101 = arith.constant 0 : index
    %c0_102 = arith.constant 0 : index
    %156 = vector.load %arg9[%c0_100, %c0_101, %c0_102] : memref<1x8x1xf32, #tpu.memory_space<vmem>>, vector<1x8x1xf32>
    %157 = vector.shape_cast %156 : vector<1x8x1xf32> to vector<8x1xf32>
    %158 = vector.shape_cast %155 : vector<8x1xf32> to vector<1x8x1xf32>
    tpu.vector_store %arg9[%c0_100, %c0_101, %c0_102], %158 {strides = array<i32>} : memref<1x8x1xf32, #tpu.memory_space<vmem>>, vector<1x8x1xf32>,
    return
  }
  func.func @transform_0(%arg0: i32) -> (i32, i32, i32) {
    %c0_i32 = arith.constant 0 : i32
    %c0_i32_0 = arith.constant 0 : i32
    %c0_i32_1 = arith.constant 0 : i32
    return %arg0, %c0_i32, %c0_i32_0 : i32, i32, i32
  }
  func.func @transform_1(%arg0: i32) -> (i32, i32) {
    %c0_i32 = arith.constant 0 : i32
    %c0_i32_0 = arith.constant 0 : i32
    %c0_i32_1 = arith.constant 0 : i32
    return %c0_i32, %c0_i32_0 : i32, i32
  }
  func.func @transform_2(%arg0: i32) -> (i32, i32) {
    %c0_i32 = arith.constant 0 : i32
    %c0_i32_0 = arith.constant 0 : i32
    %c0_i32_1 = arith.constant 0 : i32
    return %c0_i32, %c0_i32_0 : i32, i32
  }
  func.func @transform_3(%arg0: i32) -> (i32, i32, i32) {
    %c0_i32 = arith.constant 0 : i32
    %c0_i32_0 = arith.constant 0 : i32
    %c0_i32_1 = arith.constant 0 : i32
    %c0_i32_2 = arith.constant 0 : i32
    return %c0_i32, %c0_i32_0, %c0_i32_1 : i32, i32, i32
  }
  func.func @transform_4(%arg0: i32) -> (i32, i32) {
    %c0_i32 = arith.constant 0 : i32
    %c0_i32_0 = arith.constant 0 : i32
    %c0_i32_1 = arith.constant 0 : i32
    return %c0_i32, %c0_i32_0 : i32, i32
  }
  func.func @transform_5(%arg0: i32) -> (i32, i32) {
    %c0_i32 = arith.constant 0 : i32
    %c0_i32_0 = arith.constant 0 : i32
    %c0_i32_1 = arith.constant 0 : i32
    return %c0_i32, %c0_i32_0 : i32, i32
  }
  func.func @transform_6(%arg0: i32) -> (i32, i32) {
    %c0_i32 = arith.constant 0 : i32
    %c0_i32_0 = arith.constant 0 : i32
    %c0_i32_1 = arith.constant 0 : i32
    return %c0_i32, %c0_i32_0 : i32, i32
  }
  func.func @transform_7(%arg0: i32) -> (i32, i32, i32) {
    %c0_i32 = arith.constant 0 : i32
    %c0_i32_0 = arith.constant 0 : i32
    %c0_i32_1 = arith.constant 0 : i32
    return %arg0, %c0_i32, %c0_i32_0 : i32, i32, i32
  }
  func.func @transform_8(%arg0: i32) -> (i32, i32, i32) {
    %c0_i32 = arith.constant 0 : i32
    %c0_i32_0 = arith.constant 0 : i32
    %c0_i32_1 = arith.constant 0 : i32
    return %arg0, %c0_i32, %c0_i32_0 : i32, i32, i32
  }
}

</mosaic_0001>

<bundles_post_ra>
// kernel: seqnca3d_forward.1
= control target key start
LH: loop header
LB: loop body
LE: loop exit
PB: predicated region body
PF: predicated region fallthrough
CT: control target
= control target key end

     0   :  { %s5541_s27 = smov 0   ;;  %s6515_s0 = inlined_call_operand.vmem [shape: bf16[2,108,216], index: 0, kind: input, shape index: {}]   ;;  %s6516_s1 = inlined_call_operand.vmem [shape: bf16[64,108], index: 1, kind: input, shape index: {}]   ;;  %s6517_s2 = inlined_call_operand.vmem [shape: f32[64,1], index: 2, kind: input, shape index: {}]   ;;  %s6518_s3 = inlined_call_operand.vmem [shape: bf16[27,64,64], index: 3, kind: input, shape index: {}]   ;;  %s6519_s4 = inlined_call_operand.vmem [shape: f32[64,1], index: 4, kind: input, shape index: {}]   ;;  %s6520_s5 = inlined_call_operand.vmem [shape: bf16[8,64], index: 5, kind: input, shape index: {}]   ;;  %s6521_s6 = inlined_call_operand.vmem [shape: f32[8,1], index: 6, kind: input, shape index: {}]   ;;  %s6522_s7 = inlined_call_operand.vmem [shape: f32[2,64,216], index: 7, kind: output, shape index: {0}]   ;;  %s6523_s8 = inlined_call_operand.vmem [shape: f32[2,8,1], index: 8, kind: output, shape index: {1}]  }
   0x1 LB: > { %s4161_s28 = sadd.s32 4294967295, %s5465_s27   ;;  %p4165_p0 = scmp.ge.s32.totalorder %s5465_s27, 1  ;;  %s5465_s27 = sphi %s5541_s27, %s19_s27  }
   0x2   : > { %p265_p1 = scmp.lt.s32.totalorder %s5465_s27, 3 }
   0x4   : > { %p266_p2 = pnand %p4165_p0, %p265_p1 }
   0x6   : > { %269 = sbr.rel (%p266_p2) target bundleno = 1057 (0x421), region = 48 }
   0xb   : > { %p303_p3 = scmp.lt.s32.totalorder %s4161_s28, 1  ;;  %v5467_v0 = vmov 0   ;;  %v346_v1 = vld [vmem:[%s6517_s2 + $0x30] sm:$0xff]  ;;  %v344_v2 = vld [vmem:[%s6517_s2 + $0x20] sm:$0xff]  ;;  %vm489_vm0 = vcmask 1045504   ;;  %v347_v3 = vld [vmem:[%s6517_s2 + $0x38] sm:$0xff] }
   0xc   : > { %528 = vmatprep.mubr.bf16.mxu0 %v5467_v0  ;;  %5324 = vset.pattern.permute.xlu0 %v5467_v0  ;;  %v345_v4 = vld [vmem:[%s6517_s2 + $0x28] sm:$0xff]  ;;  %v342_v9 = vld [vmem:[%s6517_s2 + $0x10] sm:$0xff]  ;;  %v343_v10 = vld [vmem:[%s6517_s2 + $0x18] sm:$0xff]  ;;  %vm476_vm1 = vcmask 883712   ;;  %vm586_vm2 = vcmask 719872   ;;  %s5468_s19 = smov 42  }
   0xd   : > { %s6544_s28 = smov (!%p303_p3, %s4161_s28), 1  ;;  %5325 = vset.pattern.permute.xlu1 %v5467_v0  ;;  %380 = vperm.xlu0 %5324, %v346_v1   ;;  %v340_v13 = vld [vmem:[%s6517_s2] sm:$0xff]  ;;  %v341_v14 = vld [vmem:[%s6517_s2 + $0x8] sm:$0xff]  ;;  %v5349_v26 = vld [vmem:[%s6516_s1 + $0x10] sm:$0xff]   ;;  %s5469_s20 = smov 41   ;;  %vm662_vm3 = vcmask 523264  }
   0xe   : > { %s5286_s29 = smul.u32 112, %s6544_s28  ;;  %370 = vperm.xlu1 %5325, %v344_v2   ;;  %v5347_v24 = vld [vmem:[%s6516_s1] sm:$0xff]   ;;  %v5348_v25 = vld [vmem:[%s6516_s1 + $0x8] sm:$0xff]   ;;  %v5350_v27 = vld [vmem:[%s6516_s1 + $0x18] sm:$0xff]   ;;  %s4620_s15 = sshll.u32 %s6544_s28, 7  ;;  %vm5495_vm4 = vmmov 0  }
   0xf   : > { %s5621_s18 = scalar_lea.vmem %s6522_s7, %s4620_s15  ;;  %s5470_s23 = smov 40   ;;  %vm4073_vm5 = vcmask 7168  }
  0x10   : > { %s5561_s14 = scalar_lea.vmem %s6515_s0, %s5286_s29  ;;  %s5471_s24 = smov 35  }
  0x11   : > { %v5326_v5 = vld [vmem:[%s5561_s14 + $0x64] ss:$8 sps:$4 sm:$0x3f]   ;;  %v5328_v6 = vld [vmem:[%s5561_s14 + $0x60] ss:$8 sps:$4 sm:$0x3f]   ;;  %385 = vperm.xlu0 %5324, %v347_v3  }
  0x12   : > { %4188 = vmatprep.subr.msk.bf16.mxu0 %vm489_vm0, %v5326_v5  ;;  %v5329_v7 = vld [vmem:[%s5561_s14 + $0x54] ss:$8 sps:$4 sm:$0xff]   ;;  %v491_v8 = vsel %vm489_vm0, %v5328_v6, 0  ;;  %375 = vperm.xlu1 %5325, %v345_v4   ;;  %v5331_v11 = vld [vmem:[%s5561_s14 + $0x50] ss:$8 sps:$4 sm:$0xff]   ;;  %s5472_s25 = smov 36  }
  0x13   : > { %499 = vmatpush1.bf16.msra.mxu0 %v491_v8  ;;  %v5332_v12 = vld [vmem:[%s5561_s14 + $0x44] ss:$8 sps:$4 sm:$0xff]   ;;  %v5334_v15 = vld [vmem:[%s5561_s14 + $0x40] ss:$8 sps:$4 sm:$0xff]   ;;  %v5335_v16 = vld [vmem:[%s5561_s14 + $0x34] ss:$8 sps:$4 sm:$0xff]  }
  0x14   : > { %500 = vmatprep.subr.bf16.mxu0 %v5329_v7  ;;  %v5337_v17 = vld [vmem:[%s5561_s14 + $0x30] ss:$8 sps:$4 sm:$0xff]   ;;  %v5338_v18 = vld [vmem:[%s5561_s14 + $0x24] ss:$8 sps:$4 sm:$0xff]   ;;  %v5340_v19 = vld [vmem:[%s5561_s14 + $0x20] ss:$8 sps:$4 sm:$0xff]  }
  0x15   : > { %360 = vperm.xlu0 %5324, %v342_v9   ;;  %v5341_v20 = vld [vmem:[%s5561_s14 + $0x14] ss:$8 sps:$4 sm:$0xff]   ;;  %v5343_v21 = vld [vmem:[%s5561_s14 + $0x10] ss:$8 sps:$4 sm:$0xff]   ;;  %v5344_v22 = vld [vmem:[%s5561_s14 + $0x4] ss:$8 sps:$4 sm:$0xff]  }
  0x16   : > { %365 = vperm.xlu1 %5325, %v343_v10   ;;  %v5346_v23 = vld [vmem:[%s5561_s14] ss:$8 sps:$4 sm:$0xff]   ;;  %s5473_s30 = smov 30   ;;  %s5474_s9 = smov 34  }
  0x17   : > { %501 = vmatpush1.bf16.msra.mxu0 %v5331_v11  ;;  %s5475_s10 = smov 28   ;;  %s5476_s11 = smov 29  }
  0x18   : > { %502 = vmatprep.subr.bf16.mxu0 %v5332_v12  ;;  %s5477_s12 = smov 5   ;;  %s5478_s13 = smov 6  }
  0x19   : > { %350 = vperm.xlu0 %5324, %v340_v13   ;;  %s5479_s14 = smov 4   ;;  %s5480_s15 = smov 126  }
  0x1a   : > { %355 = vperm.xlu1 %5325, %v341_v14   ;;  %s5481_s16 = smov 127   ;;  %s5482_s17 = smov 121  }
  0x1b   : > { %503 = vmatpush1.bf16.msra.mxu0 %v5334_v15  ;;  %s5485_s22 = smov 120   ;;  %s5486_s29 = smov 96  }
  0x1c   : > { %504 = vmatprep.subr.bf16.mxu0 %v5335_v16  ;;  %s5489_s26 = smov 92  }
  0x1f   : > { %505 = vmatpush1.bf16.msra.mxu0 %v5337_v17 }
  0x20   : > { %506 = vmatprep.subr.bf16.mxu0 %v5338_v18 }
  0x23   : > { %507 = vmatpush1.bf16.msra.mxu0 %v5340_v19 }
  0x24   : > { %508 = vmatprep.subr.bf16.mxu0 %v5341_v20 }
  0x27   : > { %509 = vmatpush1.bf16.msra.mxu0 %v5343_v21 }
  0x28   : > { %510 = vmatprep.subr.bf16.mxu0 %v5344_v22 }
  0x2b   : > { %511 = vmatpush1.bf16.msra.mxu0 %v5346_v23 }
  0x2e   : > { %4189 = vmatmul.mubr.msk.bf16.vlgmr.msra.gmra.mxu0 %vm476_vm1, %v5347_v24 }
  0x2f   : > { %538 = vmatprep.mubr.bf16.mxu0 %v5467_v0 }
  0x36   : > { %4190 = vmatmul.mubr.msk.bf16.gmra.mxu0 %vm476_vm1, %v5348_v25 }
  0x37   : > { %548 = vmatprep.mubr.bf16.mxu0 %v5467_v0 }
  0x3e   : > { %4191 = vmatmul.mubr.msk.bf16.gmra.mxu0 %vm476_vm1, %v5349_v26 }
  0x3f   : > { %558 = vmatprep.mubr.bf16.mxu0 %v5467_v0 }
  0x46   : > { %4192 = vmatmul.mubr.msk.bf16.gmra.mxu0 %vm476_vm1, %v5350_v27  ;;  %v5351_v27 = vld [vmem:[%s6518_s3] sm:$0xff]  }
  0x47   : > { %4850 = vmatprep.mubr.msk.bf16.mxu1 %vm662_vm3, %v5351_v27 }
  0x88   : > { %v5611_v28 = vpop.permute.xlu0 %380 }
  0x89   : > { %v371_v29 = vpop.permute.xlu1 %370 }
  0x8c   : > { %v5613_v30 = vpop.permute.xlu0 %385 }
  0x8d   : > { %v376_v31 = vpop.permute.xlu1 %375 }
  0x90   : > { %v361_v32 = vpop.permute.xlu0 %360 }
  0x91   : > { %v366_v33 = vpop.permute.xlu1 %365 }
  0x94   : > { %v351_v34 = vpop.permute.xlu0 %350 }
  0x95   : > { %v356_v38 = vpop.permute.xlu1 %355 }
  0xee   : > { %v530_v35 = vpop.f32.mrf.mxu0 }
  0xef   : > { %v5616_v36 = vadd.f32 %v530_v35, %v351_v34 }
  0xf0   : > { %v532_v37 = vpop.f32.mrf.mxu0 }
  0xf1   : > { %v569_v39 = vmax.f32 %v5616_v36, 0.0  ;;  %v533_v40 = vadd.f32 %v532_v37, %v351_v34 }
  0xf2   : > { %v534_v41 = vpop.f32.mrf.mxu0 }
  0xf3   : > { %585 = vst [vmem:[%s5621_s18] sm:$0xff] %v569_v39  ;;  %v570_v42 = vmax.f32 %v533_v40, 0.0  ;;  %v535_v43 = vadd.f32 %v534_v41, %v356_v38  ;;  %v5352_v40 = vld [vmem:[%s6518_s3 + $0x8] sm:$0xff]  }
  0xf4   : > { %v536_v44 = vpop.f32.mrf.mxu0 }
  0xf5   : > { %587 = vst.msk [vmem:[%s5621_s18 + $0x8] sm:$0xff] %vm586_vm2, %v570_v42  ;;  %v571_v45 = vmax.f32 %v535_v43, 0.0  ;;  %v537_v46 = vadd.f32 %v536_v44, %v356_v38  ;;  %v5353_v43 = vld [vmem:[%s6518_s3 + $0x10] sm:$0xff]  }
  0xf6   : > { %v540_v47 = vpop.f32.mrf.mxu0 }
  0xf7   : > { %588 = vst [vmem:[%s5621_s18 + $0x10] sm:$0xff] %v571_v45  ;;  %v572_v48 = vmax.f32 %v537_v46, 0.0  ;;  %v5628_v49 = vadd.f32 %v540_v47, %v361_v32  ;;  %v5656_v18 = vpack.c.bf16 %v571_v45, %v569_v39  ;;  %v5354_v46 = vld [vmem:[%s6518_s3 + $0x18] sm:$0xff]  }
  0xf8   : > { %v542_v50 = vpop.f32.mrf.mxu0 }
  0xf9   : > { %589 = vst.msk [vmem:[%s5621_s18 + $0x18] sm:$0xff] %vm586_vm2, %v572_v48  ;;  %v5632_v51 = vpack.c.bf16 %v572_v48, %v570_v42  ;;  %v573_v52 = vmax.f32 %v5628_v49, 0.0  ;;  %v543_v53 = vadd.f32 %v542_v50, %v361_v32  ;;  %v5355_v49 = vld [vmem:[%s6518_s3 + $0x20] sm:$0xff]  }
  0xfa   : > { %v544_v54 = vpop.f32.mrf.mxu0 }
  0xfb   : > { %590 = vst [vmem:[%s5621_s18 + $0x20] sm:$0xff] %v573_v52  ;;  %v574_v55 = vmax.f32 %v543_v53, 0.0  ;;  %v545_v56 = vadd.f32 %v544_v54, %v366_v33  ;;  %v5356_v53 = vld [vmem:[%s6518_s3 + $0x28] sm:$0xff]  }
  0xfc   : > { %v546_v57 = vpop.f32.mrf.mxu0 }
  0xfd   : > { %591 = vst.msk [vmem:[%s5621_s18 + $0x28] sm:$0xff] %vm586_vm2, %v574_v55  ;;  %v575_v58 = vmax.f32 %v545_v56, 0.0  ;;  %v547_v59 = vadd.f32 %v546_v57, %v366_v33  ;;  %v5357_v56 = vld [vmem:[%s6518_s3 + $0x30] sm:$0xff]  }
  0xfe   : > { %v550_v60 = vpop.f32.mrf.mxu0 }
  0xff   : > { %592 = vst [vmem:[%s5621_s18 + $0x30] sm:$0xff] %v575_v58  ;;  %v576_v61 = vmax.f32 %v547_v59, 0.0  ;;  %v551_v62 = vadd.f32 %v550_v60, %v371_v29  ;;  %v5358_v59 = vld [vmem:[%s6518_s3 + $0x38] sm:$0xff]   ;;  %v5360_v60 = vld [vmem:[%s6518_s3 + $0x68] sm:$0xff]  }
 0x100   : > { %v552_v63 = vpop.f32.mrf.mxu0 }
 0x101   : > { %593 = vst.msk [vmem:[%s5621_s18 + $0x38] sm:$0xff] %vm586_vm2, %v576_v61  ;;  %v5641_v0 = vpack.c.bf16 %v576_v61, %v574_v55  ;;  %v577_v1 = vmax.f32 %v551_v62, 0.0  ;;  %v553_v2 = vadd.f32 %v552_v63, %v371_v29  ;;  %v5359_v29 = vld [vmem:[%s6518_s3 + $0x60] sm:$0xff]  }
 0x102   : > { %v554_v3 = vpop.f32.mrf.mxu0  ;;  %4898 = vmatprep.mubr.msk.bf16.mxu0 %vm662_vm3, %v5359_v29  ;;  %v5361_v63 = vld [vmem:[%s6518_s3 + $0x40] sm:$0xff]  }
 0x103   : > { %594 = vst [vmem:[%s5621_s18 + $0x40] sm:$0xff] %v577_v1  ;;  %v578_v4 = vmax.f32 %v553_v2, 0.0  ;;  %v555_v5 = vadd.f32 %v554_v3, %v376_v31  ;;  %v5375_v29 = vld [vmem:[%s6518_s3 + $0xe0] sm:$0xff]  }
 0x104   : > { %v556_v6 = vpop.f32.mrf.mxu0 }
 0x105   : > { %595 = vst.msk [vmem:[%s5621_s18 + $0x48] sm:$0xff] %vm586_vm2, %v578_v4  ;;  %v579_v7 = vmax.f32 %v555_v5, 0.0  ;;  %v557_v8 = vadd.f32 %v556_v6, %v376_v31  ;;  %v5362_v5 = vld [vmem:[%s6518_s3 + $0x48] sm:$0xff]  }
 0x106   : > { %v560_v9 = vpop.f32.mrf.mxu0 }
 0x107   : > { %596 = vst [vmem:[%s5621_s18 + $0x50] sm:$0xff] %v579_v7  ;;  %v5647_v10 = vpack.c.bf16 %v579_v7, %v577_v1  ;;  %v580_v11 = vmax.f32 %v557_v8, 0.0  ;;  %v561_v12 = vadd.f32 %v560_v9, %v5611_v28  ;;  %v5363_v1 = vld [vmem:[%s6518_s3 + $0x70] sm:$0xff]   ;;  %v5367_v9 = vld [vmem:[%s6518_s3 + $0xa0] sm:$0xff]  }
 0x108   : > { %v562_v13 = vpop.f32.mrf.mxu0  ;;  %v5365_v8 = vld [vmem:[%s6518_s3 + $0x50] sm:$0xff]  }
 0x109   : > { %597 = vst.msk [vmem:[%s5621_s18 + $0x58] sm:$0xff] %vm586_vm2, %v580_v11  ;;  %v5652_v14 = vpack.c.bf16 %v580_v11, %v578_v4  ;;  %v581_v15 = vmax.f32 %v561_v12, 0.0  ;;  %v563_v16 = vadd.f32 %v562_v13, %v5611_v28  ;;  %654 = vrot.lane.b32.xlu1 %v5647_v10, %s5468_s19  ;;  %v604_v28 = vpack.c.bf16 %v575_v58, %v573_v52  ;;  %v5364_v4 = vld [vmem:[%s6518_s3 + $0x78] sm:$0xff]  }
 0x10a   : > { %v564_v17 = vpop.f32.mrf.mxu0  ;;  %v5366_v12 = vld [vmem:[%s6518_s3 + $0x58] sm:$0xff]  }
 0x10b   : > { %598 = vst [vmem:[%s5621_s18 + $0x60] sm:$0xff] %v581_v15  ;;  %v582_v19 = vmax.f32 %v563_v16, 0.0  ;;  %v565_v20 = vadd.f32 %v564_v17, %v5613_v30  ;;  %v5368_v16 = vld [vmem:[%s6518_s3 + $0xa8] sm:$0xff]   ;;  %v5369_v17 = vld [vmem:[%s6518_s3 + $0x80] sm:$0xff]  }
 0x10c   : > { %v566_v21 = vpop.f32.mrf.mxu0 }
 0x10d   : > { %599 = vst.msk [vmem:[%s5621_s18 + $0x68] sm:$0xff] %vm586_vm2, %v582_v19  ;;  %v583_v22 = vmax.f32 %v565_v20, 0.0  ;;  %v567_v23 = vadd.f32 %v566_v21, %v5613_v30  ;;  %650 = vrot.lane.b32.xlu1 %v5656_v18, %s5468_s19  ;;  %v5371_v20 = vld [vmem:[%s6518_s3 + $0xb0] sm:$0xff]  }
 0x10f   : > { %600 = vst [vmem:[%s5621_s18 + $0x70] sm:$0xff] %v583_v22  ;;  %v5665_v24 = vpack.c.bf16 %v583_v22, %v581_v15  ;;  %v584_v25 = vmax.f32 %v567_v23, 0.0  ;;  %v5370_v23 = vld [vmem:[%s6518_s3 + $0x88] sm:$0xff]  }
 0x111   : > { %601 = vst.msk [vmem:[%s5621_s18 + $0x78] sm:$0xff] %vm586_vm2, %v584_v25  ;;  %v5669_v26 = vpack.c.bf16 %v584_v25, %v582_v19  ;;  %656 = vrot.lane.b32.xlu0 %v5665_v24, %s5468_s19  ;;  %781 = vrot.lane.b32.xlu1 %v5647_v10, %s5469_s20  ;;  %s5483_s18 = smov 122  }
 0x115   : > { %652 = vrot.lane.b32.xlu0 %v604_v28, %s5468_s19  ;;  %777 = vrot.lane.b32.xlu1 %v5656_v18, %s5469_s20  ;;  %s5484_s19 = smov 98  }
 0x119   : > { %783 = vrot.lane.b32.xlu0 %v5665_v24, %s5469_s20  ;;  %907 = vrot.lane.b32.xlu1 %v5647_v10, %s5470_s23 }
 0x11d   : > { %779 = vrot.lane.b32.xlu0 %v604_v28, %s5469_s20  ;;  %903 = vrot.lane.b32.xlu1 %v5656_v18, %s5470_s23  ;;  %s5493_s20 = smov 85  }
 0x121   : > { %909 = vrot.lane.b32.xlu0 %v5665_v24, %s5470_s23  ;;  %1161 = vrot.lane.b32.xlu1 %v5665_v24, %s5471_s24 }
 0x125   : > { %905 = vrot.lane.b32.xlu0 %v604_v28, %s5470_s23  ;;  %1159 = vrot.lane.b32.xlu1 %v5647_v10, %s5471_s24 }
 0x129   : > { %1035 = vrot.lane.b32.xlu0 %v5665_v24, %s5472_s25  ;;  %1157 = vrot.lane.b32.xlu1 %v604_v28, %s5471_s24 }
 0x12d   : > { %1033 = vrot.lane.b32.xlu0 %v5647_v10, %s5472_s25  ;;  %1155 = vrot.lane.b32.xlu1 %v5656_v18, %s5471_s24 }
 0x131   : > { %1031 = vrot.lane.b32.xlu0 %v604_v28, %s5472_s25  ;;  %1413 = vrot.lane.b32.xlu1 %v5665_v24, %s5473_s30 }
 0x135   : > { %1029 = vrot.lane.b32.xlu0 %v5656_v18, %s5472_s25  ;;  %1411 = vrot.lane.b32.xlu1 %v5647_v10, %s5473_s30 }
 0x139   : > { %1287 = vrot.lane.b32.xlu0 %v5665_v24, %s5474_s9  ;;  %1409 = vrot.lane.b32.xlu1 %v604_v28, %s5473_s30 }
 0x13d   : > { %1285 = vrot.lane.b32.xlu0 %v5647_v10, %s5474_s9  ;;  %1407 = vrot.lane.b32.xlu1 %v5656_v18, %s5473_s30 }
 0x141   : > { %1283 = vrot.lane.b32.xlu0 %v604_v28, %s5474_s9  ;;  %1665 = vrot.lane.b32.xlu1 %v5665_v24, %s5475_s10 }
 0x145   : > { %1281 = vrot.lane.b32.xlu0 %v5656_v18, %s5474_s9  ;;  %1663 = vrot.lane.b32.xlu1 %v5647_v10, %s5475_s10 }
 0x149   : > { %1539 = vrot.lane.b32.xlu0 %v5665_v24, %s5476_s11  ;;  %1661 = vrot.lane.b32.xlu1 %v604_v28, %s5475_s10 }
 0x14d   : > { %1537 = vrot.lane.b32.xlu0 %v5647_v10, %s5476_s11  ;;  %1659 = vrot.lane.b32.xlu1 %v5656_v18, %s5475_s10  ;;  %s5487_s10 = smov 97  }
 0x151   : > { %1535 = vrot.lane.b32.xlu0 %v604_v28, %s5476_s11  ;;  %1917 = vrot.lane.b32.xlu1 %v5665_v24, %s5477_s12 }
 0x155   : > { %1533 = vrot.lane.b32.xlu0 %v5656_v18, %s5476_s11  ;;  %1915 = vrot.lane.b32.xlu1 %v5647_v10, %s5477_s12 }
 0x159   : > { %1791 = vrot.lane.b32.xlu0 %v5665_v24, %s5478_s13  ;;  %1913 = vrot.lane.b32.xlu1 %v604_v28, %s5477_s12 }
 0x15d   : > { %1789 = vrot.lane.b32.xlu0 %v5647_v10, %s5478_s13  ;;  %1911 = vrot.lane.b32.xlu1 %v5656_v18, %s5477_s12 }
 0x161   : > { %1787 = vrot.lane.b32.xlu0 %v604_v28, %s5478_s13  ;;  %2041 = vrot.lane.b32.xlu1 %v5647_v10, %s5479_s14 }
 0x165   : > { %1785 = vrot.lane.b32.xlu0 %v5656_v18, %s5478_s13  ;;  %2037 = vrot.lane.b32.xlu1 %v5656_v18, %s5479_s14 }
 0x169   : > { %2043 = vrot.lane.b32.xlu0 %v5665_v24, %s5479_s14  ;;  %2413 = vrot.lane.b32.xlu1 %v5669_v26, %s5480_s15  ;;  %v5372_v24 = vld [vmem:[%s6518_s3 + $0xb8] sm:$0xff]  }
 0x16d   : > { %2039 = vrot.lane.b32.xlu0 %v604_v28, %s5479_s14  ;;  %2411 = vrot.lane.b32.xlu1 %v5652_v14, %s5480_s15  ;;  %v5373_v28 = vld [vmem:[%s6518_s3 + $0x90] sm:$0xff]  }
 0x171   : > { %2287 = vrot.lane.b32.xlu0 %v5669_v26, %s5481_s16  ;;  %2409 = vrot.lane.b32.xlu1 %v5641_v0, %s5480_s15 }
 0x175   : > { %2285 = vrot.lane.b32.xlu0 %v5652_v14, %s5481_s16  ;;  %2407 = vrot.lane.b32.xlu1 %v5632_v51, %s5480_s15  ;;  %s5490_s15 = smov 86  }
 0x179   : > { %2283 = vrot.lane.b32.xlu0 %v5641_v0, %s5481_s16  ;;  %2665 = vrot.lane.b32.xlu1 %v5669_v26, %s5482_s17 }
 0x17b   : > { %v655_v30 = vpop.permute.xlu1 %654 }
 0x17d   : > { %2281 = vrot.lane.b32.xlu0 %v5632_v51, %s5481_s16  ;;  %2663 = vrot.lane.b32.xlu1 %v5652_v14, %s5482_s17 }
 0x17f   : > { %v651_v31 = vpop.permute.xlu1 %650 }
 0x181   : > { %2539 = vrot.lane.b32.xlu0 %v5669_v26, %s5483_s18  ;;  %2661 = vrot.lane.b32.xlu1 %v5641_v0, %s5482_s17 }
 0x183   : > { %v657_v32 = vpop.permute.xlu0 %656  ;;  %v782_v33 = vpop.permute.xlu1 %781 }
 0x184   : > { %4842 = vmatprep.subr.bf16.mxu1 %v657_v32 }
 0x185   : > { %4843 = vmatpush3.bf16.msra.mxu1 %v657_v32  ;;  %2537 = vrot.lane.b32.xlu0 %v5652_v14, %s5483_s18  ;;  %v5374_v32 = vld [vmem:[%s6518_s3 + $0x98] sm:$0xff]  }
 0x186   : > { %2659 = vrot.lane.b32.xlu1 %v5632_v51, %s5482_s17  ;;  %4844 = vmatprep.subr.bf16.mxu1 %v655_v30 }
 0x187   : > { %v653_v34 = vpop.permute.xlu0 %652  ;;  %v778_v35 = vpop.permute.xlu1 %777 }
 0x189   : > { %4845 = vmatpush3.bf16.msra.mxu1 %v655_v30  ;;  %2535 = vrot.lane.b32.xlu0 %v5641_v0, %s5483_s18 }
 0x18a   : > { %2917 = vrot.lane.b32.xlu1 %v5669_v26, %s5484_s19  ;;  %4846 = vmatprep.subr.bf16.mxu1 %v653_v34 }
 0x18b   : > { %v784_v36 = vpop.permute.xlu0 %783  ;;  %v5729_v37 = vpop.permute.xlu1 %907 }
 0x18d   : > { %4847 = vmatpush3.bf16.msra.mxu1 %v653_v34  ;;  %2533 = vrot.lane.b32.xlu0 %v5632_v51, %s5483_s18 }
 0x18e   : > { %2915 = vrot.lane.b32.xlu1 %v5652_v14, %s5484_s19  ;;  %4848 = vmatprep.subr.bf16.mxu1 %v651_v31 }
 0x18f   : > { %v780_v38 = vpop.permute.xlu0 %779  ;;  %v5733_v39 = vpop.permute.xlu1 %903 }
 0x191   : > { %2791 = vrot.lane.b32.xlu0 %v5669_v26, %s5485_s22  ;;  %4849 = vmatpush3.bf16.msra.mxu1 %v651_v31 }
 0x192   : > { %2913 = vrot.lane.b32.xlu1 %v5641_v0, %s5484_s19  ;;  %4858 = vmatprep.subr.bf16.mxu1 %v784_v36 }
 0x193   : > { %v910_v41 = vpop.permute.xlu0 %909  ;;  %v5740_v42 = vpop.permute.xlu1 %1161 }
 0x194   : > { %4851 = vmatmul.mubr.msk.bf16.vlgmr.msra.gmra.mxu1 %vm662_vm3, %v5352_v40  ;;  %v5380_v40 = vld [vmem:[%s6518_s3 + $0xf8] sm:$0xff]  }
 0x195   : > { %2789 = vrot.lane.b32.xlu0 %v5652_v14, %s5485_s22  ;;  %4859 = vmatpush3.bf16.msra.mxu1 %v784_v36  ;;  %v5377_v36 = vld [vmem:[%s6518_s3 + $0xc0] sm:$0xff]  }
 0x196   : > { %2911 = vrot.lane.b32.xlu1 %v5632_v51, %s5484_s19  ;;  %4860 = vmatprep.subr.bf16.mxu1 %v782_v33  ;;  %s5488_s19 = smov 91  }
 0x197   : > { %v906_v44 = vpop.permute.xlu0 %905  ;;  %v5748_v45 = vpop.permute.xlu1 %1159  ;;  %4854 = vmatprep.mubr.msk.bf16.mxu1 %vm662_vm3, %v5353_v43 }
 0x199   : > { %2787 = vrot.lane.b32.xlu0 %v5641_v0, %s5485_s22  ;;  %4861 = vmatpush3.bf16.msra.mxu1 %v782_v33  ;;  %v5376_v33 = vld [vmem:[%s6518_s3 + $0xe8] sm:$0xff]  }
 0x19a   : > { %3169 = vrot.lane.b32.xlu1 %v5669_v26, %s5486_s29  ;;  %4862 = vmatprep.subr.bf16.mxu1 %v780_v38 }
 0x19b   : > { %v1036_v47 = vpop.permute.xlu0 %1035  ;;  %v5757_v48 = vpop.permute.xlu1 %1157 }
 0x19c   : > { %4855 = vmatmul.mubr.msk.bf16.gmra.mxu1 %vm662_vm3, %v5354_v46  ;;  %4890 = vmatprep.subr.bf16.mxu0 %v1036_v47 }
 0x19d   : > { %4891 = vmatpush3.bf16.msra.mxu0 %v1036_v47  ;;  %2785 = vrot.lane.b32.xlu0 %v5632_v51, %s5485_s22  ;;  %s5491_s22 = smov 90  }
 0x19e   : > { %3167 = vrot.lane.b32.xlu1 %v5652_v14, %s5486_s29  ;;  %4863 = vmatpush3.bf16.msra.mxu1 %v780_v38 }
 0x19f   : > { %4864 = vmatprep.subr.bf16.mxu1 %v778_v35  ;;  %v1034_v50 = vpop.permute.xlu0 %1033  ;;  %v5766_v52 = vpop.permute.xlu1 %1155  ;;  %4866 = vmatprep.mubr.msk.bf16.mxu1 %vm662_vm3, %v5355_v49  ;;  %v5382_v49 = vld [vmem:[%s6518_s3 + $0xd8] sm:$0xff]  }
 0x1a0   : > { %4892 = vmatprep.subr.bf16.mxu0 %v1034_v50 }
 0x1a1   : > { %4893 = vmatpush3.bf16.msra.mxu0 %v1034_v50  ;;  %3043 = vrot.lane.b32.xlu0 %v5669_v26, %s5487_s10  ;;  %v5385_v50 = vld [vmem:[%s6518_s3 + $0x100] sm:$0xff]  }
 0x1a2   : > { %3165 = vrot.lane.b32.xlu1 %v5641_v0, %s5486_s29  ;;  %4865 = vmatpush3.bf16.msra.mxu1 %v778_v35 }
 0x1a3   : > { %4874 = vmatprep.subr.bf16.mxu1 %v910_v41  ;;  %v1032_v54 = vpop.permute.xlu0 %1031  ;;  %v5776_v55 = vpop.permute.xlu1 %1413 }
 0x1a4   : > { %4894 = vmatprep.subr.bf16.mxu0 %v1032_v54 }
 0x1a5   : > { %4867 = vmatmul.mubr.msk.bf16.vlgmr.msra.gmra.mxu1 %vm662_vm3, %v5356_v53  ;;  %4895 = vmatpush3.bf16.msra.mxu0 %v1032_v54  ;;  %v5387_v54 = vld [vmem:[%s6518_s3 + $0x130] sm:$0xff]  }
 0x1a6   : > { %3041 = vrot.lane.b32.xlu0 %v5652_v14, %s5487_s10  ;;  %3163 = vrot.lane.b32.xlu1 %v5632_v51, %s5486_s29 }
 0x1a7   : > { %4875 = vmatpush3.bf16.msra.mxu1 %v910_v41  ;;  %v1030_v57 = vpop.permute.xlu0 %1029  ;;  %v5786_v58 = vpop.permute.xlu1 %1411  ;;  %4870 = vmatprep.mubr.msk.bf16.mxu1 %vm662_vm3, %v5357_v56  ;;  %v5378_v41 = vld [vmem:[%s6518_s3 + $0xc8] sm:$0xff]  }
 0x1a8   : > { %4876 = vmatprep.subr.bf16.mxu1 %v5729_v37  ;;  %4896 = vmatprep.subr.bf16.mxu0 %v1030_v57 }
 0x1a9   : > { %4897 = vmatpush3.bf16.msra.mxu0 %v1030_v57  ;;  %v5388_v57 = vld [vmem:[%s6518_s3 + $0x138] sm:$0xff]  }
 0x1aa   : > { %3039 = vrot.lane.b32.xlu0 %v5641_v0, %s5487_s10  ;;  %3421 = vrot.lane.b32.xlu1 %v5669_v26, %s5488_s19 }
 0x1ab   : > { %4877 = vmatpush3.bf16.msra.mxu1 %v5729_v37  ;;  %v1288_v61 = vpop.permute.xlu0 %1287  ;;  %v5801_v62 = vpop.permute.xlu1 %1409  ;;  %v5379_v37 = vld [vmem:[%s6518_s3 + $0xf0] sm:$0xff]  }
 0x1ac   : > { %4878 = vmatprep.subr.bf16.mxu1 %v906_v44  ;;  %4922 = vmatprep.subr.bf16.mxu0 %v1288_v61 }
 0x1ad   : > { %4871 = vmatmul.mubr.msk.bf16.gmra.mxu1 %vm662_vm3, %v5358_v59  ;;  %4899 = vmatmul.mubr.msk.bf16.vlgmr.msra.gmra.mxu0 %vm662_vm3, %v5360_v60  ;;  %v5389_v59 = vld [vmem:[%s6518_s3 + $0x110] sm:$0xff]  }
 0x1ae   : > { %3037 = vrot.lane.b32.xlu0 %v5632_v51, %s5487_s10  ;;  %4923 = vmatpush3.bf16.msra.mxu0 %v1288_v61 }
 0x1af   : > { %3419 = vrot.lane.b32.xlu1 %v5652_v14, %s5488_s19  ;;  %4879 = vmatpush3.bf16.msra.mxu1 %v906_v44  ;;  %v1286_v2 = vpop.permute.xlu0 %1285  ;;  %v5815_v3 = vpop.permute.xlu1 %1407  ;;  %v5381_v44 = vld [vmem:[%s6518_s3 + $0xd0] sm:$0xff]  }
 0x1b0   : > { %4880 = vmatprep.subr.bf16.mxu1 %v5733_v39  ;;  %4924 = vmatprep.subr.bf16.mxu0 %v1286_v2 }
 0x1b1   : > { %4882 = vmatprep.mubr.msk.bf16.mxu1 %vm662_vm3, %v5361_v63  ;;  %4902 = vmatprep.mubr.msk.bf16.mxu0 %vm662_vm3, %v5363_v1 }
 0x1b2   : > { %3295 = vrot.lane.b32.xlu0 %v5669_v26, %s5489_s26  ;;  %4925 = vmatpush3.bf16.msra.mxu0 %v1286_v2  ;;  %v5392_v2 = vld [vmem:[%s6518_s3 + $0x168] sm:$0xff]  }
 0x1b3   : > { %3417 = vrot.lane.b32.xlu1 %v5641_v0, %s5488_s19  ;;  %4881 = vmatpush3.bf16.msra.mxu1 %v5733_v39  ;;  %v1284_v6 = vpop.permute.xlu0 %1283  ;;  %v5831_v7 = vpop.permute.xlu1 %1665 }
 0x1b4   : > { %4906 = vmatprep.subr.bf16.mxu1 %v5740_v42  ;;  %4926 = vmatprep.subr.bf16.mxu0 %v1284_v6 }
 0x1b5   : > { %4903 = vmatmul.mubr.msk.bf16.gmra.mxu0 %vm662_vm3, %v5364_v4  ;;  %v5393_v4 = vld [vmem:[%s6518_s3 + $0x140] sm:$0xff]  }
 0x1b6   : > { %4883 = vmatmul.mubr.msk.bf16.vlgmr.msra.gmra.mxu1 %vm662_vm3, %v5362_v5  ;;  %3293 = vrot.lane.b32.xlu0 %v5652_v14, %s5489_s26 }
 0x1b7   : > { %4927 = vmatpush3.bf16.msra.mxu0 %v1284_v6  ;;  %3415 = vrot.lane.b32.xlu1 %v5632_v51, %s5488_s19  ;;  %v1282_v10 = vpop.permute.xlu0 %1281  ;;  %v5846_v11 = vpop.permute.xlu1 %1663  ;;  %s4169_s19 = sshll.u32 %s6544_s28, 3 }
 0x1b8   : > { %4907 = vmatpush3.bf16.msra.mxu1 %v5740_v42  ;;  %4928 = vmatprep.subr.bf16.mxu0 %v1282_v10  ;;  %s316_s24 = scalar_lea.vmem %s6523_s8, %s4169_s19 }
 0x1b9   : > { %4908 = vmatprep.subr.bf16.mxu1 %v5748_v45  ;;  %4886 = vmatprep.mubr.msk.bf16.mxu1 %vm662_vm3, %v5365_v8 }
 0x1ba   : > { %3291 = vrot.lane.b32.xlu0 %v5641_v0, %s5489_s26  ;;  %4930 = vmatprep.mubr.msk.bf16.mxu0 %vm662_vm3, %v5367_v9 }
 0x1bb   : > { %4929 = vmatpush3.bf16.msra.mxu0 %v1282_v10  ;;  %3673 = vrot.lane.b32.xlu1 %v5669_v26, %s5490_s15  ;;  %v1540_v13 = vpop.permute.xlu0 %1539  ;;  %v5859_v15 = vpop.permute.xlu1 %1661  ;;  %v5396_v10 = vld [vmem:[%s6518_s3 + $0x178] sm:$0xff]  }
 0x1bc   : > { %4909 = vmatpush3.bf16.msra.mxu1 %v5748_v45  ;;  %4954 = vmatprep.subr.bf16.mxu0 %v1540_v13  ;;  %v5383_v45 = vld [vmem:[%s6518_s3 + $0x120] sm:$0xff]  }
 0x1bd   : > { %4910 = vmatprep.subr.bf16.mxu1 %v5757_v48 }
 0x1be   : > { %4887 = vmatmul.mubr.msk.bf16.gmra.mxu1 %vm662_vm3, %v5366_v12  ;;  %3289 = vrot.lane.b32.xlu0 %v5632_v51, %s5489_s26  ;;  %v5397_v12 = vld [vmem:[%s6518_s3 + $0x150] sm:$0xff]  }
 0x1bf   : > { %4931 = vmatmul.mubr.msk.bf16.vlgmr.msra.gmra.mxu0 %vm662_vm3, %v5368_v16  ;;  %3671 = vrot.lane.b32.xlu1 %v5652_v14, %s5490_s15  ;;  %v1538_v18 = vpop.permute.xlu0 %1537  ;;  %v5875_v19 = vpop.permute.xlu1 %1659 }
 0x1c0   : > { %4955 = vmatpush3.bf16.msra.mxu0 %v1540_v13  ;;  %4911 = vmatpush3.bf16.msra.mxu1 %v5757_v48  ;;  %v5384_v48 = vld [vmem:[%s6518_s3 + $0x128] sm:$0xff]  }
 0x1c1   : > { %4912 = vmatprep.subr.bf16.mxu1 %v5766_v52  ;;  %4956 = vmatprep.subr.bf16.mxu0 %v1538_v18 }
 0x1c2   : > { %3547 = vrot.lane.b32.xlu0 %v5669_v26, %s5491_s22  ;;  %4914 = vmatprep.mubr.msk.bf16.mxu1 %vm662_vm3, %v5369_v17 }
 0x1c3   : > { %3669 = vrot.lane.b32.xlu1 %v5641_v0, %s5490_s15  ;;  %v1536_v21 = vpop.permute.xlu0 %1535  ;;  %v5887_v22 = vpop.permute.xlu1 %1917  ;;  %4934 = vmatprep.mubr.msk.bf16.mxu0 %vm662_vm3, %v5371_v20  ;;  %v5401_v20 = vld [vmem:[%s6518_s3 + $0x180] sm:$0xff]  }
 0x1c4   : > { %4957 = vmatpush3.bf16.msra.mxu0 %v1538_v18  ;;  %4913 = vmatpush3.bf16.msra.mxu1 %v5766_v52  ;;  %v5400_v18 = vld [vmem:[%s6518_s3 + $0x1a8] sm:$0xff]  }
 0x1c5   : > { %4938 = vmatprep.subr.bf16.mxu1 %v5776_v55  ;;  %4958 = vmatprep.subr.bf16.mxu0 %v1536_v21 }
 0x1c6   : > { %3545 = vrot.lane.b32.xlu0 %v5652_v14, %s5491_s22 }
 0x1c7   : > { %4915 = vmatmul.mubr.msk.bf16.vlgmr.msra.gmra.mxu1 %vm662_vm3, %v5370_v23  ;;  %4935 = vmatmul.mubr.msk.bf16.gmra.mxu0 %vm662_vm3, %v5372_v24  ;;  %v1534_v25 = vpop.permute.xlu0 %1533  ;;  %v5902_v27 = vpop.permute.xlu1 %1915  ;;  %v5404_v24 = vld [vmem:[%s6518_s3 + $0x1b8] sm:$0xff]  }
 0x1c8   : > { %4959 = vmatpush3.bf16.msra.mxu0 %v1536_v21  ;;  %3667 = vrot.lane.b32.xlu1 %v5632_v51, %s5490_s15  ;;  %s5492_s15 = smov 84  }
 0x1c9   : > { %4939 = vmatpush3.bf16.msra.mxu1 %v5776_v55  ;;  %4960 = vmatprep.subr.bf16.mxu0 %v1534_v25 }
 0x1ca   : > { %4940 = vmatprep.subr.bf16.mxu1 %v5786_v58  ;;  %3543 = vrot.lane.b32.xlu0 %v5641_v0, %s5491_s22 }
 0x1cb   : > { %v1792_v30 = vpop.permute.xlu0 %1791  ;;  %4918 = vmatprep.mubr.msk.bf16.mxu1 %vm662_vm3, %v5373_v28  ;;  %v5917_v31 = vpop.permute.xlu1 %1913  ;;  %4962 = vmatprep.mubr.msk.bf16.mxu0 %vm662_vm3, %v5375_v29  ;;  %v5407_v28 = vld [vmem:[%s6518_s3 + $0x1e0] sm:$0xff]  }
 0x1cc   : > { %4961 = vmatpush3.bf16.msra.mxu0 %v1534_v25  ;;  %3925 = vrot.lane.b32.xlu1 %v5669_v26, %s5492_s15  ;;  %v5402_v25 = vld [vmem:[%s6518_s3 + $0x188] sm:$0xff]  }
 0x1cd   : > { %4941 = vmatpush3.bf16.msra.mxu1 %v5786_v58  ;;  %4986 = vmatprep.subr.bf16.mxu0 %v1792_v30  ;;  %v5386_v58 = vld [vmem:[%s6518_s3 + $0x108] sm:$0xff]  }
 0x1ce   : > { %4942 = vmatprep.subr.bf16.mxu1 %v5801_v62  ;;  %3541 = vrot.lane.b32.xlu0 %v5632_v51, %s5491_s22 }
 0x1cf   : > { %4919 = vmatmul.mubr.msk.bf16.gmra.mxu1 %vm662_vm3, %v5374_v32  ;;  %4963 = vmatmul.mubr.msk.bf16.vlgmr.msra.gmra.mxu0 %vm662_vm3, %v5376_v33  ;;  %v1790_v34 = vpop.permute.xlu0 %1789  ;;  %v5934_v35 = vpop.permute.xlu1 %1911  ;;  %v5409_v32 = vld [vmem:[%s6518_s3 + $0x1c0] sm:$0xff]  }
 0x1d0   : > { %4987 = vmatpush3.bf16.msra.mxu0 %v1792_v30  ;;  %3923 = vrot.lane.b32.xlu1 %v5652_v14, %s5492_s15  ;;  %v5408_v30 = vld [vmem:[%s6518_s3 + $0x1e8] sm:$0xff]  }
 0x1d1   : > { %4943 = vmatpush3.bf16.msra.mxu1 %v5801_v62  ;;  %4988 = vmatprep.subr.bf16.mxu0 %v1790_v34  ;;  %v5391_v62 = vld [vmem:[%s6518_s3 + $0x160] sm:$0xff]  }
 0x1d2   : > { %4944 = vmatprep.subr.bf16.mxu1 %v5815_v3  ;;  %3799 = vrot.lane.b32.xlu0 %v5669_v26, %s5493_s20 }
 0x1d3   : > { %v1788_v38 = vpop.permute.xlu0 %1787  ;;  %4946 = vmatprep.mubr.msk.bf16.mxu1 %vm662_vm3, %v5377_v36  ;;  %v2042_v39 = vpop.permute.xlu1 %2041  ;;  %4966 = vmatprep.mubr.msk.bf16.mxu0 %vm662_vm3, %v5379_v37  ;;  %v5412_v37 = vld [vmem:[%s6518_s3 + $0x1f8] sm:$0xff]  }
 0x1d4   : > { %4989 = vmatpush3.bf16.msra.mxu0 %v1790_v34  ;;  %3921 = vrot.lane.b32.xlu1 %v5641_v0, %s5492_s15 }
 0x1d5   : > { %4945 = vmatpush3.bf16.msra.mxu1 %v5815_v3  ;;  %4990 = vmatprep.subr.bf16.mxu0 %v1788_v38  ;;  %v5390_v3 = vld [vmem:[%s6518_s3 + $0x118] sm:$0xff]  }
 0x1d6   : > { %4970 = vmatprep.subr.bf16.mxu1 %v5831_v7  ;;  %3797 = vrot.lane.b32.xlu0 %v5652_v14, %s5493_s20 }
 0x1d7   : > { %4967 = vmatmul.mubr.msk.bf16.gmra.mxu0 %vm662_vm3, %v5380_v40  ;;  %v1786_v42 = vpop.permute.xlu0 %1785  ;;  %v2038_v43 = vpop.permute.xlu1 %2037  ;;  %v5413_v40 = vld [vmem:[%s6518_s3 + $0x1d0] sm:$0xff]  }
 0x1d8   : > { %4947 = vmatmul.mubr.msk.bf16.vlgmr.msra.gmra.mxu1 %vm662_vm3, %v5378_v41  ;;  %4991 = vmatpush3.bf16.msra.mxu0 %v1788_v38  ;;  %v5410_v38 = vld [vmem:[%s6518_s3 + $0x1c8] sm:$0xff]   ;;  %v5415_v41 = vld [vmem:[%s6518_s3 + $0x220] sm:$0xff]  }
 0x1d9   : > { %3919 = vrot.lane.b32.xlu1 %v5632_v51, %s5492_s15  ;;  %4971 = vmatpush3.bf16.msra.mxu1 %v5831_v7  ;;  %v5395_v7 = vld [vmem:[%s6518_s3 + $0x170] sm:$0xff]  }
 0x1da   : > { %4972 = vmatprep.subr.bf16.mxu1 %v5846_v11  ;;  %4992 = vmatprep.subr.bf16.mxu0 %v1786_v42 }
 0x1db   : > { %3795 = vrot.lane.b32.xlu0 %v5641_v0, %s5493_s20  ;;  %v2044_v46 = vpop.permute.xlu0 %2043  ;;  %4950 = vmatprep.mubr.msk.bf16.mxu1 %vm662_vm3, %v5381_v44  ;;  %v5977_v47 = vpop.permute.xlu1 %2413  ;;  %v5416_v44 = vld [vmem:[%s6518_s3 + $0x228] sm:$0xff]  }
 0x1dc   : > { %4993 = vmatpush3.bf16.msra.mxu0 %v1786_v42  ;;  %4994 = vmatprep.mubr.msk.bf16.mxu0 %vm662_vm3, %v5383_v45 }
 0x1dd   : > { %4973 = vmatpush3.bf16.msra.mxu1 %v5846_v11  ;;  %5018 = vmatprep.subr.bf16.mxu0 %v2044_v46  ;;  %v5394_v11 = vld [vmem:[%s6518_s3 + $0x148] sm:$0xff]  }
 0x1de   : > { %4974 = vmatprep.subr.bf16.mxu1 %v5859_v15 }
 0x1df   : > { %3793 = vrot.lane.b32.xlu0 %v5632_v51, %s5493_s20  ;;  %4995 = vmatmul.mubr.msk.bf16.vlgmr.msra.gmra.mxu0 %vm662_vm3, %v5384_v48  ;;  %v2040_v52 = vpop.permute.xlu0 %2039  ;;  %v5994_v53 = vpop.permute.xlu1 %2411  ;;  %v5419_v48 = vld [vmem:[%s6518_s3 + $0x230] sm:$0xff]  }
 0x1e0   : > { %4951 = vmatmul.mubr.msk.bf16.gmra.mxu1 %vm662_vm3, %v5382_v49  ;;  %5019 = vmatpush3.bf16.msra.mxu0 %v2044_v46  ;;  %v5414_v46 = vld [vmem:[%s6518_s3 + $0x1d8] sm:$0xff]  }
 0x1e1   : > { %4975 = vmatpush3.bf16.msra.mxu1 %v5859_v15  ;;  %5020 = vmatprep.subr.bf16.mxu0 %v2042_v39  ;;  %v5399_v15 = vld [vmem:[%s6518_s3 + $0x1a0] sm:$0xff]  }
 0x1e2   : > { %4976 = vmatprep.subr.bf16.mxu1 %v5875_v19  ;;  %4978 = vmatprep.mubr.msk.bf16.mxu1 %vm662_vm3, %v5385_v50 }
 0x1e3   : > { %v2288_v55 = vpop.permute.xlu0 %2287  ;;  %v6003_v56 = vpop.permute.xlu1 %2409  ;;  %4998 = vmatprep.mubr.msk.bf16.mxu0 %vm662_vm3, %v5387_v54  ;;  %v5418_v54 = vld [vmem:[%s6518_s3 + $0x208] sm:$0xff]  }
 0x1e4   : > { %5021 = vmatpush3.bf16.msra.mxu0 %v2042_v39 }
 0x1e5   : > { %4977 = vmatpush3.bf16.msra.mxu1 %v5875_v19  ;;  %5022 = vmatprep.subr.bf16.mxu0 %v2040_v52  ;;  %v5398_v19 = vld [vmem:[%s6518_s3 + $0x158] sm:$0xff]  }
 0x1e6   : > { %5002 = vmatprep.subr.bf16.mxu1 %v5887_v22 }
 0x1e7   : > { %4999 = vmatmul.mubr.msk.bf16.gmra.mxu0 %vm662_vm3, %v5388_v57  ;;  %v2286_v60 = vpop.permute.xlu0 %2285  ;;  %v6018_v61 = vpop.permute.xlu1 %2407  ;;  %v5423_v57 = vld [vmem:[%s6518_s3 + $0x260] sm:$0xff]  }
 0x1e8   : > { %4979 = vmatmul.mubr.msk.bf16.vlgmr.msra.gmra.mxu1 %vm662_vm3, %v5386_v58  ;;  %5023 = vmatpush3.bf16.msra.mxu0 %v2040_v52  ;;  %v5420_v52 = vld [vmem:[%s6518_s3 + $0x238] sm:$0xff]  }
 0x1e9   : > { %5003 = vmatpush3.bf16.msra.mxu1 %v5887_v22  ;;  %5024 = vmatprep.subr.bf16.mxu0 %v2038_v43  ;;  %v5403_v22 = vld [vmem:[%s6518_s3 + $0x1b0] sm:$0xff]  }
 0x1ea   : > { %5004 = vmatprep.subr.bf16.mxu1 %v5902_v27  ;;  %4982 = vmatprep.mubr.msk.bf16.mxu1 %vm662_vm3, %v5389_v59  ;;  %v5424_v59 = vld [vmem:[%s6518_s3 + $0x268] sm:$0xff]  }
 0x1eb   : > { %v2284_v63 = vpop.permute.xlu0 %2283  ;;  %v6027_v1 = vpop.permute.xlu1 %2665  ;;  %5026 = vmatprep.mubr.msk.bf16.mxu0 %vm662_vm3, %v5391_v62 }
 0x1ec   : > { %5025 = vmatpush3.bf16.msra.mxu0 %v2038_v43 }
 0x1ed   : > { %5005 = vmatpush3.bf16.msra.mxu1 %v5902_v27  ;;  %5050 = vmatprep.subr.bf16.mxu0 %v2288_v55 }
 0x1ee   : > { %5006 = vmatprep.subr.bf16.mxu1 %v5917_v31 }
 0x1ef   : > { %5027 = vmatmul.mubr.msk.bf16.vlgmr.msra.gmra.mxu0 %vm662_vm3, %v5392_v2  ;;  %v2282_v5 = vpop.permute.xlu0 %2281  ;;  %v6042_v6 = vpop.permute.xlu1 %2663 }
 0x1f0   : > { %4983 = vmatmul.mubr.msk.bf16.gmra.mxu1 %vm662_vm3, %v5390_v3  ;;  %5051 = vmatpush3.bf16.msra.mxu0 %v2288_v55  ;;  %v5421_v55 = vld [vmem:[%s6518_s3 + $0x210] sm:$0xff]  }
 0x1f1   : > { %5007 = vmatpush3.bf16.msra.mxu1 %v5917_v31  ;;  %5052 = vmatprep.subr.bf16.mxu0 %v2286_v60  ;;  %v5406_v31 = vld [vmem:[%s6518_s3 + $0x198] sm:$0xff]  }
 0x1f2   : > { %5008 = vmatprep.subr.bf16.mxu1 %v5934_v35  ;;  %5010 = vmatprep.mubr.msk.bf16.mxu1 %vm662_vm3, %v5393_v4  ;;  %v5428_v4 = vld [vmem:[%s6518_s3 + $0x278] sm:$0xff]  }
 0x1f3   : > { %v2540_v8 = vpop.permute.xlu0 %2539  ;;  %v6051_v9 = vpop.permute.xlu1 %2661  ;;  %5030 = vmatprep.mubr.msk.bf16.mxu0 %vm662_vm3, %v5395_v7  ;;  %v5429_v7 = vld [vmem:[%s6518_s3 + $0x250] sm:$0xff]  }
 0x1f4   : > { %5053 = vmatpush3.bf16.msra.mxu0 %v2286_v60 }
 0x1f5   : > { %5009 = vmatpush3.bf16.msra.mxu1 %v5934_v35  ;;  %5054 = vmatprep.subr.bf16.mxu0 %v2284_v63  ;;  %v5411_v35 = vld [vmem:[%s6518_s3 + $0x1f0] sm:$0xff]  }
 0x1f6   : > { %5034 = vmatprep.subr.bf16.mxu1 %v5669_v26 }
 0x1f7   : > { %5031 = vmatmul.mubr.msk.bf16.gmra.mxu0 %vm662_vm3, %v5396_v10  ;;  %v2538_v13 = vpop.permute.xlu0 %2537 }
 0x1f8   : > { %5011 = vmatmul.mubr.msk.bf16.vlgmr.msra.gmra.mxu1 %vm662_vm3, %v5394_v11  ;;  %5055 = vmatpush3.bf16.msra.mxu0 %v2284_v63  ;;  %v6070_v16 = vpop.permute.xlu1 %2659  ;;  %v5425_v63 = vld [vmem:[%s6518_s3 + $0x240] sm:$0xff]   ;;  %v5432_v11 = vld [vmem:[%s6518_s3 + $0x2a8] sm:$0xff]  }
 0x1f9   : > { %5035 = vmatpush3.bf16.msra.mxu1 %v5669_v26  ;;  %5056 = vmatprep.subr.bf16.mxu0 %v2282_v5 }
 0x1fa   : > { %5036 = vmatprep.subr.bf16.mxu1 %v5652_v14  ;;  %5014 = vmatprep.mubr.msk.bf16.mxu1 %vm662_vm3, %v5397_v12 }
 0x1fb   : > { %v2536_v17 = vpop.permute.xlu0 %2535  ;;  %5058 = vmatprep.mubr.msk.bf16.mxu0 %vm662_vm3, %v5399_v15  ;;  %v5433_v15 = vld [vmem:[%s6518_s3 + $0x280] sm:$0xff]  }
 0x1fc   : > { %5057 = vmatpush3.bf16.msra.mxu0 %v2282_v5  ;;  %v6083_v26 = vpop.permute.xlu1 %2917 }
 0x1fd   : > { %5037 = vmatpush3.bf16.msra.mxu1 %v5652_v14  ;;  %5082 = vmatprep.subr.bf16.mxu0 %v2540_v8 }
 0x1fe   : > { %5038 = vmatprep.subr.bf16.mxu1 %v5641_v0 }
 0x1ff   : > { %5059 = vmatmul.mubr.msk.bf16.vlgmr.msra.gmra.mxu0 %vm662_vm3, %v5400_v18  ;;  %v2534_v21 = vpop.permute.xlu0 %2533 }
 0x200   : > { %5015 = vmatmul.mubr.msk.bf16.gmra.mxu1 %vm662_vm3, %v5398_v19  ;;  %5083 = vmatpush3.bf16.msra.mxu0 %v2540_v8  ;;  %v6097_v14 = vpop.permute.xlu1 %2915  ;;  %v5431_v8 = vld [vmem:[%s6518_s3 + $0x2a0] sm:$0xff]   ;;  %v5436_v19 = vld [vmem:[%s6518_s3 + $0x2b8] sm:$0xff]  }
 0x201   : > { %5039 = vmatpush3.bf16.msra.mxu1 %v5641_v0  ;;  %5084 = vmatprep.subr.bf16.mxu0 %v2538_v13  ;;  %v5405_v0 = vld [vmem:[%s6518_s3 + $0x190] sm:$0xff]  }
 0x202   : > { %5040 = vmatprep.subr.bf16.mxu1 %v5632_v51  ;;  %5042 = vmatprep.mubr.msk.bf16.mxu1 %vm662_vm3, %v5401_v20 }
 0x203   : > { %v2792_v23 = vpop.permute.xlu0 %2791  ;;  %5062 = vmatprep.mubr.msk.bf16.mxu0 %vm662_vm3, %v5403_v22  ;;  %v5437_v22 = vld [vmem:[%s6518_s3 + $0x290] sm:$0xff]  }
 0x204   : > { %5085 = vmatpush3.bf16.msra.mxu0 %v2538_v13  ;;  %v6116_v29 = vpop.permute.xlu1 %2913  ;;  %v5430_v13 = vld [vmem:[%s6518_s3 + $0x258] sm:$0xff]  }
 0x205   : > { %5041 = vmatpush3.bf16.msra.mxu1 %v5632_v51  ;;  %5086 = vmatprep.subr.bf16.mxu0 %v2536_v17 }
 0x206   : > { %5066 = vmatprep.subr.bf16.mxu1 %v5977_v47 }
 0x207   : > { %5063 = vmatmul.mubr.msk.bf16.gmra.mxu0 %vm662_vm3, %v5404_v24  ;;  %v2790_v27 = vpop.permute.xlu0 %2789  ;;  %v5440_v24 = vld [vmem:[%s6518_s3 + $0x2e8] sm:$0xff]  }
 0x208   : > { %5043 = vmatmul.mubr.msk.bf16.vlgmr.msra.gmra.mxu1 %vm662_vm3, %v5402_v25  ;;  %5087 = vmatpush3.bf16.msra.mxu0 %v2536_v17  ;;  %v6133_v33 = vpop.permute.xlu1 %2911  ;;  %v5435_v17 = vld [vmem:[%s6518_s3 + $0x2b0] sm:$0xff]  }
 0x209   : > { %5067 = vmatpush3.bf16.msra.mxu1 %v5977_v47  ;;  %5088 = vmatprep.subr.bf16.mxu0 %v2534_v21  ;;  %v5417_v47 = vld [vmem:[%s6518_s3 + $0x200] sm:$0xff]  }
 0x20a   : > { %5068 = vmatprep.subr.bf16.mxu1 %v5994_v53  ;;  %5046 = vmatprep.mubr.msk.bf16.mxu1 %vm662_vm3, %v5405_v0  ;;  %v5438_v0 = vld [vmem:[%s6518_s3 + $0x298] sm:$0xff]  }
 0x20b   : > { %v2788_v51 = vpop.permute.xlu0 %2787  ;;  %5090 = vmatprep.mubr.msk.bf16.mxu0 %vm662_vm3, %v5407_v28  ;;  %v5445_v28 = vld [vmem:[%s6518_s3 + $0x2f0] sm:$0xff]  }
 0x20c   : > { %5089 = vmatpush3.bf16.msra.mxu0 %v2534_v21  ;;  %v6150_v39 = vpop.permute.xlu1 %3169 }
 0x20d   : > { %5069 = vmatpush3.bf16.msra.mxu1 %v5994_v53  ;;  %5114 = vmatprep.subr.bf16.mxu0 %v2792_v23 }
 0x20e   : > { %5070 = vmatprep.subr.bf16.mxu1 %v6003_v56 }
 0x20f   : > { %5091 = vmatmul.mubr.msk.bf16.vlgmr.msra.gmra.mxu0 %vm662_vm3, %v5408_v30  ;;  %v2786_v34 = vpop.permute.xlu0 %2785  ;;  %v5446_v30 = vld [vmem:[%s6518_s3 + $0x2f8] sm:$0xff]  }
 0x210   : > { %5047 = vmatmul.mubr.msk.bf16.gmra.mxu1 %vm662_vm3, %v5406_v31  ;;  %5115 = vmatpush3.bf16.msra.mxu0 %v2792_v23  ;;  %v6165_v43 = vpop.permute.xlu1 %3167 }
 0x211   : > { %5071 = vmatpush3.bf16.msra.mxu1 %v6003_v56  ;;  %5116 = vmatprep.subr.bf16.mxu0 %v2790_v27 }
 0x212   : > { %5072 = vmatprep.subr.bf16.mxu1 %v6018_v61  ;;  %5074 = vmatprep.mubr.msk.bf16.mxu1 %vm662_vm3, %v5409_v32  ;;  %v5442_v32 = vld [vmem:[%s6518_s3 + $0x2c8] sm:$0xff]  }
 0x213   : > { %v3044_v36 = vpop.permute.xlu0 %3043  ;;  %5094 = vmatprep.mubr.msk.bf16.mxu0 %vm662_vm3, %v5411_v35 }
 0x214   : > { %5117 = vmatpush3.bf16.msra.mxu0 %v2790_v27  ;;  %v6184_v50 = vpop.permute.xlu1 %3165  ;;  %v5441_v27 = vld [vmem:[%s6518_s3 + $0x2c0] sm:$0xff]  }
 0x215   : > { %5073 = vmatpush3.bf16.msra.mxu1 %v6018_v61  ;;  %5118 = vmatprep.subr.bf16.mxu0 %v2788_v51  ;;  %v5422_v61 = vld [vmem:[%s6518_s3 + $0x218] sm:$0xff]  }
 0x216   : > { %5098 = vmatprep.subr.bf16.mxu1 %v6027_v1 }
 0x217   : > { %5095 = vmatmul.mubr.msk.bf16.gmra.mxu0 %vm662_vm3, %v5412_v37 }
 0x218   : > { %5075 = vmatmul.mubr.msk.bf16.vlgmr.msra.gmra.mxu1 %vm662_vm3, %v5410_v38  ;;  %5119 = vmatpush3.bf16.msra.mxu0 %v2788_v51  ;;  %v3042_v42 = vpop.permute.xlu0 %3041  ;;  %v6201_v56 = vpop.permute.xlu1 %3163 }
 0x219   : > { %5099 = vmatpush3.bf16.msra.mxu1 %v6027_v1  ;;  %5120 = vmatprep.subr.bf16.mxu0 %v2786_v34  ;;  %v5427_v1 = vld [vmem:[%s6518_s3 + $0x270] sm:$0xff]  }
 0x21a   : > { %5100 = vmatprep.subr.bf16.mxu1 %v6042_v6  ;;  %5078 = vmatprep.mubr.msk.bf16.mxu1 %vm662_vm3, %v5413_v40  ;;  %v5450_v40 = vld [vmem:[%s6518_s3 + $0x328] sm:$0xff]  }
 0x21b   : > { %5122 = vmatprep.mubr.msk.bf16.mxu0 %vm662_vm3, %v5415_v41 }
 0x21c   : > { %5121 = vmatpush3.bf16.msra.mxu0 %v2786_v34  ;;  %v3040_v45 = vpop.permute.xlu0 %3039  ;;  %v6218_v62 = vpop.permute.xlu1 %3421  ;;  %v5443_v34 = vld [vmem:[%s6518_s3 + $0x2d0] sm:$0xff]  }
 0x21d   : > { %5101 = vmatpush3.bf16.msra.mxu1 %v6042_v6  ;;  %5146 = vmatprep.subr.bf16.mxu0 %v3044_v36  ;;  %v5426_v6 = vld [vmem:[%s6518_s3 + $0x248] sm:$0xff]  }
 0x21e   : > { %5102 = vmatprep.subr.bf16.mxu1 %v6051_v9 }
 0x21f   : > { %5123 = vmatmul.mubr.msk.bf16.vlgmr.msra.gmra.mxu0 %vm662_vm3, %v5416_v44  ;;  %v5447_v44 = vld [vmem:[%s6518_s3 + $0x300] sm:$0xff]  }
 0x220   : > { %5079 = vmatmul.mubr.msk.bf16.gmra.mxu1 %vm662_vm3, %v5414_v46  ;;  %5147 = vmatpush3.bf16.msra.mxu0 %v3044_v36  ;;  %v3038_v49 = vpop.permute.xlu0 %3037  ;;  %v5449_v36 = vld [vmem:[%s6518_s3 + $0x320] sm:$0xff]  }
 0x221   : > { %5103 = vmatpush3.bf16.msra.mxu1 %v6051_v9  ;;  %5148 = vmatprep.subr.bf16.mxu0 %v3042_v42  ;;  %v3420_v3 = vpop.permute.xlu1 %3419 }
 0x222   : > { %5104 = vmatprep.subr.bf16.mxu1 %v6070_v16  ;;  %5106 = vmatprep.mubr.msk.bf16.mxu1 %vm662_vm3, %v5417_v47 }
 0x223   : > { %5126 = vmatprep.mubr.msk.bf16.mxu0 %vm662_vm3, %v5419_v48  ;;  %v612_v48 = vld [vmem:[%s6519_s4 + $0x10] sm:$0xff] }
 0x224   : > { %5149 = vmatpush3.bf16.msra.mxu0 %v3042_v42  ;;  %v3296_v53 = vpop.permute.xlu0 %3295  ;;  %v5444_v42 = vld [vmem:[%s6518_s3 + $0x2d8] sm:$0xff]  }
 0x225   : > { %5105 = vmatpush3.bf16.msra.mxu1 %v6070_v16  ;;  %5150 = vmatprep.subr.bf16.mxu0 %v3040_v45  ;;  %v3418_v10 = vpop.permute.xlu1 %3417 }
 0x226   : > { %5130 = vmatprep.subr.bf16.mxu1 %v6083_v26 }
 0x227   : > { %5127 = vmatmul.mubr.msk.bf16.gmra.mxu0 %vm662_vm3, %v5420_v52  ;;  %v5454_v52 = vld [vmem:[%s6518_s3 + $0x338] sm:$0xff]  }
 0x228   : > { %5107 = vmatmul.mubr.msk.bf16.vlgmr.msra.gmra.mxu1 %vm662_vm3, %v5418_v54  ;;  %5151 = vmatpush3.bf16.msra.mxu0 %v3040_v45  ;;  %v3294_v58 = vpop.permute.xlu0 %3293 }
 0x229   : > { %5131 = vmatpush3.bf16.msra.mxu1 %v6083_v26  ;;  %5152 = vmatprep.subr.bf16.mxu0 %v3038_v49  ;;  %v3416_v16 = vpop.permute.xlu1 %3415  ;;  %v5434_v26 = vld [vmem:[%s6518_s3 + $0x288] sm:$0xff]  }
 0x22a   : > { %5132 = vmatprep.subr.bf16.mxu1 %v6097_v14  ;;  %5110 = vmatprep.mubr.msk.bf16.mxu1 %vm662_vm3, %v5421_v55  ;;  %v5448_v55 = vld [vmem:[%s6518_s3 + $0x308] sm:$0xff]  }
 0x22b   : > { %5154 = vmatprep.mubr.msk.bf16.mxu0 %vm662_vm3, %v5423_v57 }
 0x22c   : > { %5153 = vmatpush3.bf16.msra.mxu0 %v3038_v49  ;;  %v3292_v60 = vpop.permute.xlu0 %3291 }
 0x22d   : > { %5133 = vmatpush3.bf16.msra.mxu1 %v6097_v14  ;;  %5178 = vmatprep.subr.bf16.mxu0 %v3296_v53  ;;  %v3674_v20 = vpop.permute.xlu1 %3673  ;;  %v5439_v14 = vld [vmem:[%s6518_s3 + $0x2e0] sm:$0xff]  }
 0x22e   : > { %5134 = vmatprep.subr.bf16.mxu1 %v6116_v29 }
 0x22f   : > { %5155 = vmatmul.mubr.msk.bf16.vlgmr.msra.gmra.mxu0 %vm662_vm3, %v5424_v59 }
 0x230   : > { %5111 = vmatmul.mubr.msk.bf16.gmra.mxu1 %vm662_vm3, %v5422_v61  ;;  %5179 = vmatpush3.bf16.msra.mxu0 %v3296_v53  ;;  %v3290_v2 = vpop.permute.xlu0 %3289  ;;  %v611_v61 = vld [vmem:[%s6519_s4 + $0x8] sm:$0xff] }
 0x231   : > { %5135 = vmatpush3.bf16.msra.mxu1 %v6116_v29  ;;  %5180 = vmatprep.subr.bf16.mxu0 %v3294_v58  ;;  %v3672_v23 = vpop.permute.xlu1 %3671 }
 0x232   : > { %5136 = vmatprep.subr.bf16.mxu1 %v6133_v33  ;;  %5138 = vmatprep.mubr.msk.bf16.mxu1 %vm662_vm3, %v5425_v63 }
 0x233   : > { %5158 = vmatprep.mubr.msk.bf16.mxu0 %vm662_vm3, %v5427_v1 }
 0x234   : > { %5181 = vmatpush3.bf16.msra.mxu0 %v3294_v58  ;;  %v3548_v5 = vpop.permute.xlu0 %3547  ;;  %v5451_v58 = vld [vmem:[%s6518_s3 + $0x310] sm:$0xff]  }
 0x235   : > { %5137 = vmatpush3.bf16.msra.mxu1 %v6133_v33  ;;  %5182 = vmatprep.subr.bf16.mxu0 %v3292_v60  ;;  %v3670_v29 = vpop.permute.xlu1 %3669 }
 0x236   : > { %5162 = vmatprep.subr.bf16.mxu1 %v6150_v39 }
 0x237   : > { %5159 = vmatmul.mubr.msk.bf16.gmra.mxu0 %vm662_vm3, %v5428_v4 }
 0x238   : > { %5139 = vmatmul.mubr.msk.bf16.vlgmr.msra.gmra.mxu1 %vm662_vm3, %v5426_v6  ;;  %5183 = vmatpush3.bf16.msra.mxu0 %v3292_v60  ;;  %v3546_v9 = vpop.permute.xlu0 %3545 }
 0x239   : > { %5163 = vmatpush3.bf16.msra.mxu1 %v6150_v39  ;;  %5184 = vmatprep.subr.bf16.mxu0 %v3290_v2 }
 0x23a   : > { %5164 = vmatprep.subr.bf16.mxu1 %v6165_v43  ;;  %5142 = vmatprep.mubr.msk.bf16.mxu1 %vm662_vm3, %v5429_v7  ;;  %v3668_v35 = vpop.permute.xlu1 %3667  ;;  %v614_v7 = vld [vmem:[%s6519_s4 + $0x20] sm:$0xff] }
 0x23b   : > { %5186 = vmatprep.mubr.msk.bf16.mxu0 %vm662_vm3, %v5431_v8 }
 0x23c   : > { %5185 = vmatpush3.bf16.msra.mxu0 %v3290_v2  ;;  %v3544_v12 = vpop.permute.xlu0 %3543  ;;  %v616_v2 = vld [vmem:[%s6519_s4 + $0x30] sm:$0xff] }
 0x23d   : > { %5165 = vmatpush3.bf16.msra.mxu1 %v6165_v43  ;;  %5210 = vmatprep.subr.bf16.mxu0 %v3548_v5  ;;  %v5453_v43 = vld [vmem:[%s6518_s3 + $0x330] sm:$0xff]  }
 0x23e   : > { %5166 = vmatprep.subr.bf16.mxu1 %v6184_v50  ;;  %v3926_v45 = vpop.permute.xlu1 %3925 }
 0x23f   : > { %5187 = vmatmul.mubr.msk.bf16.vlgmr.msra.gmra.mxu0 %vm662_vm3, %v5432_v11  ;;  %v5452_v11 = vld [vmem:[%s6518_s3 + $0x318] sm:$0xff]  }
 0x240   : > { %5143 = vmatmul.mubr.msk.bf16.gmra.mxu1 %vm662_vm3, %v5430_v13  ;;  %5211 = vmatpush3.bf16.msra.mxu0 %v3548_v5  ;;  %v3542_v18 = vpop.permute.xlu0 %3541 }
 0x241   : > { %5167 = vmatpush3.bf16.msra.mxu1 %v6184_v50  ;;  %5212 = vmatprep.subr.bf16.mxu0 %v3546_v9  ;;  %v610_v50 = vld [vmem:[%s6519_s4] sm:$0xff] }
 0x242   : > { %5168 = vmatprep.subr.bf16.mxu1 %v6201_v56  ;;  %5170 = vmatprep.mubr.msk.bf16.mxu1 %vm662_vm3, %v5433_v15  ;;  %v3924_v53 = vpop.permute.xlu1 %3923  ;;  %v5455_v15 = vld [vmem:[%s6518_s3 + $0x340] sm:$0xff]  }
 0x243   : > { %5190 = vmatprep.mubr.msk.bf16.mxu0 %vm662_vm3, %v5435_v17 }
 0x244   : > { %5213 = vmatpush3.bf16.msra.mxu0 %v3546_v9  ;;  %v3800_v21 = vpop.permute.xlu0 %3799 }
 0x245   : > { %5169 = vmatpush3.bf16.msra.mxu1 %v6201_v56  ;;  %5214 = vmatprep.subr.bf16.mxu0 %v3544_v12  ;;  %v613_v56 = vld [vmem:[%s6519_s4 + $0x18] sm:$0xff] }
 0x246   : > { %5194 = vmatprep.subr.bf16.mxu1 %v6218_v62  ;;  %v3922_v4 = vpop.permute.xlu1 %3921 }
 0x247   : > { %5191 = vmatmul.mubr.msk.bf16.gmra.mxu0 %vm662_vm3, %v5436_v19  ;;  %v615_v19 = vld [vmem:[%s6519_s4 + $0x28] sm:$0xff] }
 0x248   : > { %5171 = vmatmul.mubr.msk.bf16.vlgmr.msra.gmra.mxu1 %vm662_vm3, %v5434_v26  ;;  %5215 = vmatpush3.bf16.msra.mxu0 %v3544_v12  ;;  %v3798_v25 = vpop.permute.xlu0 %3797  ;;  %v617_v12 = vld [vmem:[%s6519_s4 + $0x38] sm:$0xff] }
 0x249   : > { %5195 = vmatpush3.bf16.msra.mxu1 %v6218_v62  ;;  %5216 = vmatprep.subr.bf16.mxu0 %v3542_v18 }
 0x24a   : > { %5196 = vmatprep.subr.bf16.mxu1 %v3420_v3  ;;  %5174 = vmatprep.mubr.msk.bf16.mxu1 %vm662_vm3, %v5437_v22 }
 0x24b   : > { %5218 = vmatprep.mubr.msk.bf16.mxu0 %vm662_vm3, %v5439_v14 }
 0x24c   : > { %5217 = vmatpush3.bf16.msra.mxu0 %v3542_v18 }
 0x24d   : > { %5197 = vmatpush3.bf16.msra.mxu1 %v3420_v3  ;;  %5242 = vmatprep.subr.bf16.mxu0 %v3800_v21  ;;  %v3796_v51 = vpop.permute.xlu0 %3795 }
 0x24e   : > { %5198 = vmatprep.subr.bf16.mxu1 %v3418_v10 }
 0x24f   : > { %5219 = vmatmul.mubr.msk.bf16.vlgmr.msra.gmra.mxu0 %vm662_vm3, %v5440_v24 }
 0x250   : > { %5175 = vmatmul.mubr.msk.bf16.gmra.mxu1 %vm662_vm3, %v5438_v0  ;;  %5243 = vmatpush3.bf16.msra.mxu0 %v3800_v21  ;;  %v3920_v21 = vpop.permute.xlu1 %3919 }
 0x251   : > { %5199 = vmatpush3.bf16.msra.mxu1 %v3418_v10  ;;  %5244 = vmatprep.subr.bf16.mxu0 %v3798_v25  ;;  %v3794_v37 = vpop.permute.xlu0 %3793 }
 0x252   : > { %5200 = vmatprep.subr.bf16.mxu1 %v3416_v16  ;;  %5202 = vmatprep.mubr.msk.bf16.mxu1 %vm662_vm3, %v5441_v27 }
 0x253   : > { %5222 = vmatprep.mubr.msk.bf16.mxu0 %vm662_vm3, %v5445_v28 }
 0x254   : > { %5245 = vmatpush3.bf16.msra.mxu0 %v3798_v25  ;;  %v4852_v31 = vpop.f32.mrf.mxu1 }
 0x255   : > { %5201 = vmatpush3.bf16.msra.mxu1 %v3416_v16  ;;  %5246 = vmatprep.subr.bf16.mxu0 %v3796_v51  ;;  %v742_v54 = vadd.f32 %v4852_v31, %v612_v48 }
 0x256   : > { %5226 = vmatprep.subr.bf16.mxu1 %v3674_v20  ;;  %v709_v33 = vpop.f32.mrf.mxu1 }
 0x257   : > { %5223 = vmatmul.mubr.msk.bf16.gmra.mxu0 %vm662_vm3, %v5446_v30  ;;  %v740_v59 = vadd.f32 %v709_v33, %v610_v50  ;;  %v5457_v30 = vld [vmem:[%s6518_s3 + $0x350] sm:$0xff]  }
 0x258   : > { %5203 = vmatmul.mubr.msk.bf16.vlgmr.msra.gmra.mxu1 %vm662_vm3, %v5442_v32  ;;  %5247 = vmatpush3.bf16.msra.mxu0 %v3796_v51  ;;  %v4853_v38 = vpop.f32.mrf.mxu1  ;;  %v5456_v51 = vld [vmem:[%s6518_s3 + $0x348] sm:$0xff]  }
 0x259   : > { %5227 = vmatpush3.bf16.msra.mxu1 %v3674_v20  ;;  %5248 = vmatprep.subr.bf16.mxu0 %v3794_v37  ;;  %v743_v63 = vadd.f32 %v4853_v38, %v613_v56 }
 0x25a   : > { %5228 = vmatprep.subr.bf16.mxu1 %v3672_v23  ;;  %v712_v39 = vpop.f32.mrf.mxu1  ;;  %5206 = vmatprep.mubr.msk.bf16.mxu1 %vm662_vm3, %v5443_v34 }
 0x25b   : > { %5250 = vmatprep.mubr.msk.bf16.mxu0 %vm662_vm3, %v5449_v36  ;;  %v741_v5 = vadd.f32 %v712_v39, %v611_v61 }
 0x25c   : > { %5249 = vmatpush3.bf16.msra.mxu0 %v3794_v37  ;;  %v4856_v41 = vpop.f32.mrf.mxu1 }
 0x25d   : > { %5229 = vmatpush3.bf16.msra.mxu1 %v3672_v23  ;;  %v746_v9 = vadd.f32 %v4856_v41, %v616_v2 }
 0x25e   : > { %5230 = vmatprep.subr.bf16.mxu1 %v3670_v29  ;;  %v725_v46 = vpop.f32.mrf.mxu1 }
 0x25f   : > { %5251 = vmatmul.mubr.msk.bf16.vlgmr.msra.gmra.mxu0 %vm662_vm3, %v5450_v40  ;;  %v744_v17 = vadd.f32 %v725_v46, %v614_v7 }
 0x260   : > { %5207 = vmatmul.mubr.msk.bf16.gmra.mxu1 %vm662_vm3, %v5444_v42  ;;  %v4857_v47 = vpop.f32.mrf.mxu1  ;;  %5254 = vmatprep.mubr.msk.bf16.mxu0 %vm662_vm3, %v5453_v43 }
 0x261   : > { %5231 = vmatpush3.bf16.msra.mxu1 %v3670_v29  ;;  %5234 = vmatprep.mubr.msk.bf16.mxu1 %vm662_vm3, %v5447_v44  ;;  %v747_v22 = vadd.f32 %v4857_v47, %v617_v12  ;;  %v5458_v44 = vld [vmem:[%s6518_s3 + $0x358] sm:$0xff]  }
 0x262   : > { %5232 = vmatprep.subr.bf16.mxu1 %v3668_v35  ;;  %v728_v49 = vpop.f32.mrf.mxu1 }
 0x263   : > { %v745_v25 = vadd.f32 %v728_v49, %v615_v19 }
 0x265   : > { %5233 = vmatpush3.bf16.msra.mxu1 %v3668_v35  ;;  %v4868_v57 = vpop.f32.mrf.mxu1 }
 0x266   : > { %5258 = vmatprep.subr.bf16.mxu1 %v3926_v45  ;;  %v868_v60 = vadd.f32 %v4868_v57, %v742_v54 }
 0x267   : > { %v835_v62 = vpop.f32.mrf.mxu1  ;;  %5255 = vmatmul.mubr.msk.bf16.gmra.mxu0 %vm662_vm3, %v5454_v52 }
 0x268   : > { %5235 = vmatmul.mubr.msk.bf16.vlgmr.msra.gmra.mxu1 %vm662_vm3, %v5448_v55  ;;  %v866_v1 = vadd.f32 %v835_v62, %v740_v59 }
 0x269   : > { %5259 = vmatpush3.bf16.msra.mxu1 %v3926_v45  ;;  %v4869_v3 = vpop.f32.mrf.mxu1  ;;  %5238 = vmatprep.mubr.msk.bf16.mxu1 %vm662_vm3, %v5451_v58 }
 0x26a   : > { %5260 = vmatprep.subr.bf16.mxu1 %v3924_v53  ;;  %v869_v6 = vadd.f32 %v4869_v3, %v743_v63 }
 0x26b   : > { %v838_v8 = vpop.f32.mrf.mxu1 }
 0x26c   : > { %v867_v10 = vadd.f32 %v838_v8, %v741_v5 }
 0x26d   : > { %5261 = vmatpush3.bf16.msra.mxu1 %v3924_v53  ;;  %v4872_v13 = vpop.f32.mrf.mxu1  ;;  %v4900_v16 = vpop.f32.mrf.mxu0 }
 0x26e   : > { %5262 = vmatprep.subr.bf16.mxu1 %v3922_v4  ;;  %v872_v18 = vadd.f32 %v4872_v13, %v746_v9 }
 0x26f   : > { %v851_v26 = vpop.f32.mrf.mxu1  ;;  %v1087_v20 = vpop.f32.mrf.mxu0 }
 0x270   : > { %5239 = vmatmul.mubr.msk.bf16.gmra.mxu1 %vm662_vm3, %v5452_v11  ;;  %v870_v14 = vadd.f32 %v851_v26, %v744_v17 }
 0x271   : > { %5263 = vmatpush3.bf16.msra.mxu1 %v3922_v4  ;;  %v4873_v23 = vpop.f32.mrf.mxu1  ;;  %5266 = vmatprep.mubr.msk.bf16.mxu1 %vm662_vm3, %v5455_v15  ;;  %v4901_v24 = vpop.f32.mrf.mxu0 }
 0x272   : > { %5264 = vmatprep.subr.bf16.mxu1 %v3920_v21  ;;  %v873_v0 = vadd.f32 %v4873_v23, %v747_v22 }
 0x273   : > { %v854_v27 = vpop.f32.mrf.mxu1  ;;  %v1090_v28 = vpop.f32.mrf.mxu0 }
 0x274   : > { %v871_v29 = vadd.f32 %v854_v27, %v745_v25 }
 0x275   : > { %5265 = vmatpush3.bf16.msra.mxu1 %v3920_v21  ;;  %v4904_v31 = vpop.f32.mrf.mxu0 }
 0x276   : > { %v4884_v32 = vpop.f32.mrf.mxu1 }
 0x277   : > { %v994_v33 = vadd.f32 %v4884_v32, %v868_v60  ;;  %v1103_v34 = vpop.f32.mrf.mxu0 }
 0x278   : > { %5267 = vmatmul.mubr.msk.bf16.vlgmr.msra.gmra.mxu1 %vm662_vm3, %v5456_v51  ;;  %v961_v35 = vpop.f32.mrf.mxu1 }
 0x279   : > { %v992_v36 = vadd.f32 %v961_v35, %v866_v1  ;;  %v1120_v37 = vadd.f32 %v4900_v16, %v994_v33  ;;  %5270 = vmatprep.mubr.msk.bf16.mxu1 %vm662_vm3, %v5457_v30  ;;  %v4905_v38 = vpop.f32.mrf.mxu0 }
 0x27a   : > { %v4885_v39 = vpop.f32.mrf.mxu1 }
 0x27b   : > { %v995_v40 = vadd.f32 %v4885_v39, %v869_v6  ;;  %v1118_v41 = vadd.f32 %v1087_v20, %v992_v36  ;;  %v1106_v42 = vpop.f32.mrf.mxu0 }
 0x27c   : > { %v964_v43 = vpop.f32.mrf.mxu1 }
 0x27d   : > { %v993_v45 = vadd.f32 %v964_v43, %v867_v10  ;;  %v1121_v46 = vadd.f32 %v4901_v24, %v995_v40 }
 0x27e   : > { %v4888_v47 = vpop.f32.mrf.mxu1 }
 0x27f   : > { %v998_v48 = vadd.f32 %v4888_v47, %v872_v18  ;;  %v1119_v49 = vadd.f32 %v1090_v28, %v993_v45  ;;  %v4932_v50 = vpop.f32.mrf.mxu0 }
 0x280   : > { %5271 = vmatmul.mubr.msk.bf16.gmra.mxu1 %vm662_vm3, %v5458_v44  ;;  %v977_v52 = vpop.f32.mrf.mxu1 }
 0x281   : > { %v996_v53 = vadd.f32 %v977_v52, %v870_v14  ;;  %v1124_v54 = vadd.f32 %v4904_v31, %v998_v48  ;;  %v1339_v55 = vpop.f32.mrf.mxu0 }
 0x282   : > { %v4889_v56 = vpop.f32.mrf.mxu1 }
 0x283   : > { %v999_v57 = vadd.f32 %v4889_v56, %v873_v0  ;;  %v1122_v58 = vadd.f32 %v1103_v34, %v996_v53  ;;  %v4933_v59 = vpop.f32.mrf.mxu0 }
 0x284   : > { %v980_v60 = vpop.f32.mrf.mxu1 }
 0x285   : > { %v997_v61 = vadd.f32 %v980_v60, %v871_v29  ;;  %v1125_v62 = vadd.f32 %v4905_v38, %v999_v57  ;;  %v1342_v63 = vpop.f32.mrf.mxu0 }
 0x287   : > { %v1123_v1 = vadd.f32 %v1106_v42, %v997_v61  ;;  %v4916_v2 = vpop.f32.mrf.mxu1  ;;  %v4936_v3 = vpop.f32.mrf.mxu0 }
 0x288   : > { %v1246_v4 = vadd.f32 %v4916_v2, %v1120_v37 }
 0x289   : > { %v1213_v5 = vpop.f32.mrf.mxu1  ;;  %v1355_v6 = vpop.f32.mrf.mxu0 }
 0x28a   : > { %v1244_v7 = vadd.f32 %v1213_v5, %v1118_v41  ;;  %v1372_v8 = vadd.f32 %v4932_v50, %v1246_v4 }
 0x28b   : > { %v4917_v9 = vpop.f32.mrf.mxu1  ;;  %v4937_v10 = vpop.f32.mrf.mxu0 }
 0x28c   : > { %v1247_v11 = vadd.f32 %v4917_v9, %v1121_v46  ;;  %v1370_v12 = vadd.f32 %v1339_v55, %v1244_v7 }
 0x28d   : > { %v1216_v13 = vpop.f32.mrf.mxu1  ;;  %v1358_v15 = vpop.f32.mrf.mxu0 }
 0x28e   : > { %v1245_v16 = vadd.f32 %v1216_v13, %v1119_v49  ;;  %v1373_v17 = vadd.f32 %v4933_v59, %v1247_v11 }
 0x28f   : > { %v4920_v18 = vpop.f32.mrf.mxu1  ;;  %v4964_v19 = vpop.f32.mrf.mxu0 }
 0x290   : > { %v1250_v26 = vadd.f32 %v4920_v18, %v1124_v54  ;;  %v1371_v20 = vadd.f32 %v1342_v63, %v1245_v16 }
 0x291   : > { %v1229_v21 = vpop.f32.mrf.mxu1  ;;  %v1591_v22 = vpop.f32.mrf.mxu0 }
 0x292   : > { %v1248_v14 = vadd.f32 %v1229_v21, %v1122_v58  ;;  %v1376_v23 = vadd.f32 %v4936_v3, %v1250_v26 }
 0x293   : > { %v4921_v24 = vpop.f32.mrf.mxu1  ;;  %v4965_v25 = vpop.f32.mrf.mxu0 }
 0x294   : > { %v1251_v0 = vadd.f32 %v4921_v24, %v1125_v62  ;;  %v1374_v27 = vadd.f32 %v1355_v6, %v1248_v14 }
 0x295   : > { %v1232_v28 = vpop.f32.mrf.mxu1  ;;  %v1594_v29 = vpop.f32.mrf.mxu0 }
 0x296   : > { %v1249_v51 = vadd.f32 %v1232_v28, %v1123_v1  ;;  %v1377_v30 = vadd.f32 %v4937_v10, %v1251_v0 }
 0x297   : > { %v4968_v31 = vpop.f32.mrf.mxu0 }
 0x298   : > { %v1375_v32 = vadd.f32 %v1358_v15, %v1249_v51  ;;  %v4948_v33 = vpop.f32.mrf.mxu1 }
 0x299   : > { %v1498_v34 = vadd.f32 %v4948_v33, %v1372_v8  ;;  %v1607_v35 = vpop.f32.mrf.mxu0 }
 0x29a   : > { %v1465_v36 = vpop.f32.mrf.mxu1 }
 0x29b   : > { %v1496_v37 = vadd.f32 %v1465_v36, %v1370_v12  ;;  %v1624_v38 = vadd.f32 %v4964_v19, %v1498_v34  ;;  %v4969_v39 = vpop.f32.mrf.mxu0 }
 0x29c   : > { %v4949_v40 = vpop.f32.mrf.mxu1 }
 0x29d   : > { %v1499_v41 = vadd.f32 %v4949_v40, %v1373_v17  ;;  %v1622_v42 = vadd.f32 %v1591_v22, %v1496_v37  ;;  %v1610_v43 = vpop.f32.mrf.mxu0 }
 0x29e   : > { %v1468_v44 = vpop.f32.mrf.mxu1 }
 0x29f   : > { %v1497_v45 = vadd.f32 %v1468_v44, %v1371_v20  ;;  %v1625_v46 = vadd.f32 %v4965_v25, %v1499_v41  ;;  %v4996_v47 = vpop.f32.mrf.mxu0 }
 0x2a0   : > { %v4952_v48 = vpop.f32.mrf.mxu1 }
 0x2a1   : > { %v1502_v49 = vadd.f32 %v4952_v48, %v1376_v23  ;;  %v1623_v50 = vadd.f32 %v1594_v29, %v1497_v45  ;;  %v1843_v52 = vpop.f32.mrf.mxu0 }
 0x2a2   : > { %v1481_v53 = vpop.f32.mrf.mxu1 }
 0x2a3   : > { %v1500_v54 = vadd.f32 %v1481_v53, %v1374_v27  ;;  %v1628_v55 = vadd.f32 %v4968_v31, %v1502_v49  ;;  %v4997_v56 = vpop.f32.mrf.mxu0 }
 0x2a4   : > { %v4953_v57 = vpop.f32.mrf.mxu1 }
 0x2a5   : > { %v1503_v58 = vadd.f32 %v4953_v57, %v1377_v30  ;;  %v1626_v59 = vadd.f32 %v1607_v35, %v1500_v54  ;;  %v1846_v60 = vpop.f32.mrf.mxu0 }
 0x2a6   : > { %v1484_v61 = vpop.f32.mrf.mxu1 }
 0x2a7   : > { %v1501_v62 = vadd.f32 %v1484_v61, %v1375_v32  ;;  %v1629_v63 = vadd.f32 %v4969_v39, %v1503_v58  ;;  %v5000_v1 = vpop.f32.mrf.mxu0 }
 0x2a8   : > { %v4980_v2 = vpop.f32.mrf.mxu1 }
 0x2a9   : > { %v1627_v3 = vadd.f32 %v1610_v43, %v1501_v62  ;;  %v1750_v4 = vadd.f32 %v4980_v2, %v1624_v38  ;;  %v1859_v5 = vpop.f32.mrf.mxu0 }
 0x2aa   : > { %v1717_v6 = vpop.f32.mrf.mxu1 }
 0x2ab   : > { %v1748_v7 = vadd.f32 %v1717_v6, %v1622_v42  ;;  %v1876_v8 = vadd.f32 %v4996_v47, %v1750_v4  ;;  %v5001_v9 = vpop.f32.mrf.mxu0 }
 0x2ac   : > { %v4981_v10 = vpop.f32.mrf.mxu1 }
 0x2ad   : > { %v1751_v11 = vadd.f32 %v4981_v10, %v1625_v46  ;;  %v1874_v12 = vadd.f32 %v1843_v52, %v1748_v7  ;;  %v1862_v13 = vpop.f32.mrf.mxu0  ;;  %v6524_v7 = vmov 0.0  }
 0x2ae   : > { %v1720_v15 = vpop.f32.mrf.mxu1  ;;  %5274 = vmatprep.subr.bf16.mxu0 %v6524_v7  ;;  %5282 = vmatprep.mubr.msk.bf16.mxu0 %vm5495_vm4, %v6524_v7 }
 0x2af   : > { %v1749_v16 = vadd.f32 %v1720_v15, %v1623_v50  ;;  %v1877_v17 = vadd.f32 %v4997_v56, %v1751_v11  ;;  %v5028_v18 = vpop.f32.mrf.mxu0 }
 0x2b0   : > { %v4984_v19 = vpop.f32.mrf.mxu1 }
 0x2b1   : > { %v1754_v26 = vadd.f32 %v4984_v19, %v1628_v55  ;;  %v1875_v20 = vadd.f32 %v1846_v60, %v1749_v16  ;;  %v2095_v21 = vpop.f32.mrf.mxu0 }
 0x2b2   : > { %v1733_v22 = vpop.f32.mrf.mxu1 }
 0x2b3   : > { %v1752_v14 = vadd.f32 %v1733_v22, %v1626_v59  ;;  %v1880_v23 = vadd.f32 %v5000_v1, %v1754_v26  ;;  %v5029_v24 = vpop.f32.mrf.mxu0 }
 0x2b4   : > { %v4985_v25 = vpop.f32.mrf.mxu1 }
 0x2b5   : > { %v1755_v0 = vadd.f32 %v4985_v25, %v1629_v63  ;;  %v1878_v27 = vadd.f32 %v1859_v5, %v1752_v14  ;;  %v2098_v28 = vpop.f32.mrf.mxu0 }
 0x2b6   : > { %v1736_v29 = vpop.f32.mrf.mxu1 }
 0x2b7   : > { %v1753_v51 = vadd.f32 %v1736_v29, %v1627_v3  ;;  %v1881_v30 = vadd.f32 %v5001_v9, %v1755_v0  ;;  %v5032_v31 = vpop.f32.mrf.mxu0 }
 0x2b8   : > { %v5012_v32 = vpop.f32.mrf.mxu1 }
 0x2b9   : > { %v1879_v33 = vadd.f32 %v1862_v13, %v1753_v51  ;;  %v2002_v34 = vadd.f32 %v5012_v32, %v1876_v8  ;;  %v2111_v35 = vpop.f32.mrf.mxu0 }
 0x2ba   : > { %v1969_v36 = vpop.f32.mrf.mxu1 }
 0x2bb   : > { %v2000_v37 = vadd.f32 %v1969_v36, %v1874_v12  ;;  %v2128_v38 = vadd.f32 %v5028_v18, %v2002_v34  ;;  %v5033_v39 = vpop.f32.mrf.mxu0 }
 0x2bc   : > { %v5013_v40 = vpop.f32.mrf.mxu1 }
 0x2bd   : > { %v2003_v41 = vadd.f32 %v5013_v40, %v1877_v17  ;;  %v2126_v42 = vadd.f32 %v2095_v21, %v2000_v37  ;;  %v2114_v43 = vpop.f32.mrf.mxu0 }
 0x2be   : > { %v1972_v44 = vpop.f32.mrf.mxu1 }
 0x2bf   : > { %v2001_v45 = vadd.f32 %v1972_v44, %v1875_v20  ;;  %v2129_v46 = vadd.f32 %v5029_v24, %v2003_v41  ;;  %v5060_v47 = vpop.f32.mrf.mxu0 }
 0x2c0   : > { %v5016_v48 = vpop.f32.mrf.mxu1 }
 0x2c1   : > { %v2006_v49 = vadd.f32 %v5016_v48, %v1880_v23  ;;  %v2127_v50 = vadd.f32 %v2098_v28, %v2001_v45  ;;  %v2339_v52 = vpop.f32.mrf.mxu0 }
 0x2c2   : > { %v1985_v53 = vpop.f32.mrf.mxu1 }
 0x2c3   : > { %v2004_v54 = vadd.f32 %v1985_v53, %v1878_v27  ;;  %v2132_v55 = vadd.f32 %v5032_v31, %v2006_v49  ;;  %v5061_v56 = vpop.f32.mrf.mxu0 }
 0x2c4   : > { %v5017_v57 = vpop.f32.mrf.mxu1 }
 0x2c5   : > { %v2007_v58 = vadd.f32 %v5017_v57, %v1881_v30  ;;  %v2130_v59 = vadd.f32 %v2111_v35, %v2004_v54  ;;  %v2342_v60 = vpop.f32.mrf.mxu0 }
 0x2c6   : > { %v1988_v61 = vpop.f32.mrf.mxu1 }
 0x2c7   : > { %v2005_v62 = vadd.f32 %v1988_v61, %v1879_v33  ;;  %v2133_v63 = vadd.f32 %v5033_v39, %v2007_v58  ;;  %v5064_v1 = vpop.f32.mrf.mxu0 }
 0x2c8   : > { %v5044_v2 = vpop.f32.mrf.mxu1 }
 0x2c9   : > { %v2131_v3 = vadd.f32 %v2114_v43, %v2005_v62  ;;  %v2242_v4 = vadd.f32 %v5044_v2, %v2128_v38  ;;  %v2355_v5 = vpop.f32.mrf.mxu0 }
 0x2ca   : > { %v2209_v6 = vpop.f32.mrf.mxu1 }
 0x2cb   : > { %v2240_v8 = vadd.f32 %v2209_v6, %v2126_v42  ;;  %v2372_v9 = vadd.f32 %v5060_v47, %v2242_v4  ;;  %v5065_v10 = vpop.f32.mrf.mxu0 }
 0x2cc   : > { %v5045_v11 = vpop.f32.mrf.mxu1 }
 0x2cd   : > { %v2243_v12 = vadd.f32 %v5045_v11, %v2129_v46  ;;  %v2370_v13 = vadd.f32 %v2339_v52, %v2240_v8  ;;  %v2358_v15 = vpop.f32.mrf.mxu0 }
 0x2ce   : > { %v2212_v16 = vpop.f32.mrf.mxu1 }
 0x2cf   : > { %v2241_v17 = vadd.f32 %v2212_v16, %v2127_v50  ;;  %v2373_v18 = vadd.f32 %v5061_v56, %v2243_v12  ;;  %v5092_v19 = vpop.f32.mrf.mxu0 }
 0x2d0   : > { %v5048_v26 = vpop.f32.mrf.mxu1 }
 0x2d1   : > { %v2246_v20 = vadd.f32 %v5048_v26, %v2132_v55  ;;  %v2371_v21 = vadd.f32 %v2342_v60, %v2241_v17  ;;  %v2591_v22 = vpop.f32.mrf.mxu0 }
 0x2d2   : > { %v2225_v14 = vpop.f32.mrf.mxu1 }
 0x2d3   : > { %v2244_v23 = vadd.f32 %v2225_v14, %v2130_v59  ;;  %v2376_v24 = vadd.f32 %v5064_v1, %v2246_v20  ;;  %v5093_v25 = vpop.f32.mrf.mxu0 }
 0x2d4   : > { %v5049_v0 = vpop.f32.mrf.mxu1 }
 0x2d5   : > { %v2247_v27 = vadd.f32 %v5049_v0, %v2133_v63  ;;  %v2374_v28 = vadd.f32 %v2355_v5, %v2244_v23  ;;  %v2594_v29 = vpop.f32.mrf.mxu0 }
 0x2d6   : > { %v2228_v51 = vpop.f32.mrf.mxu1 }
 0x2d7   : > { %v2245_v30 = vadd.f32 %v2228_v51, %v2131_v3  ;;  %v2377_v31 = vadd.f32 %v5065_v10, %v2247_v27  ;;  %v5096_v32 = vpop.f32.mrf.mxu0 }
 0x2d8   : > { %v5076_v33 = vpop.f32.mrf.mxu1 }
 0x2d9   : > { %v2375_v34 = vadd.f32 %v2358_v15, %v2245_v30  ;;  %v2498_v35 = vadd.f32 %v5076_v33, %v2372_v9  ;;  %v2607_v36 = vpop.f32.mrf.mxu0 }
 0x2da   : > { %v2465_v37 = vpop.f32.mrf.mxu1 }
 0x2db   : > { %v2496_v38 = vadd.f32 %v2465_v37, %v2370_v13  ;;  %v2624_v39 = vadd.f32 %v5092_v19, %v2498_v35  ;;  %v6399_v40 = vpop.f32.mrf.mxu0 }
 0x2dc   : > { %v5077_v41 = vpop.f32.mrf.mxu1 }
 0x2dd   : > { %v2499_v42 = vadd.f32 %v5077_v41, %v2373_v18  ;;  %v2622_v43 = vadd.f32 %v2591_v22, %v2496_v38  ;;  %v6401_v44 = vpop.f32.mrf.mxu0 }
 0x2de   : > { %v2468_v45 = vpop.f32.mrf.mxu1 }
 0x2df   : > { %v2497_v46 = vadd.f32 %v2468_v45, %v2371_v21  ;;  %v2625_v47 = vadd.f32 %v5093_v25, %v2499_v42  ;;  %v5124_v48 = vpop.f32.mrf.mxu0 }
 0x2e0   : > { %v5080_v49 = vpop.f32.mrf.mxu1 }
 0x2e1   : > { %v2502_v50 = vadd.f32 %v5080_v49, %v2376_v24  ;;  %v2623_v52 = vadd.f32 %v2594_v29, %v2497_v46  ;;  %v2843_v53 = vpop.f32.mrf.mxu0 }
 0x2e2   : > { %v2481_v54 = vpop.f32.mrf.mxu1 }
 0x2e3   : > { %v2500_v55 = vadd.f32 %v2481_v54, %v2374_v28  ;;  %v2628_v56 = vadd.f32 %v5096_v32, %v2502_v50  ;;  %v5125_v57 = vpop.f32.mrf.mxu0 }
 0x2e4   : > { %v5081_v58 = vpop.f32.mrf.mxu1 }
 0x2e5   : > { %v6403_v59 = vadd.f32 %v5081_v58, %v2377_v31  ;;  %v2626_v60 = vadd.f32 %v2607_v36, %v2500_v55  ;;  %v2846_v61 = vpop.f32.mrf.mxu0 }
 0x2e6   : > { %v2484_v62 = vpop.f32.mrf.mxu1 }
 0x2e7   : > { %v6405_v63 = vadd.f32 %v2484_v62, %v2375_v34  ;;  %v6407_v1 = vpop.f32.mrf.mxu0 }
 0x2e8   : > { %v5108_v2 = vpop.f32.mrf.mxu1 }
 0x2e9   : > { %v2750_v3 = vadd.f32 %v5108_v2, %v2624_v39  ;;  %v6409_v4 = vpop.f32.mrf.mxu0 }
 0x2ea   : > { %v2717_v5 = vpop.f32.mrf.mxu1 }
 0x2eb   : > { %v2748_v6 = vadd.f32 %v2717_v5, %v2622_v43  ;;  %v2876_v8 = vadd.f32 %v5124_v48, %v2750_v3  ;;  %v6411_v9 = vpop.f32.mrf.mxu0 }
 0x2ec   : > { %v5109_v10 = vpop.f32.mrf.mxu1 }
 0x2ed   : > { %v2751_v11 = vadd.f32 %v5109_v10, %v2625_v47  ;;  %v2874_v12 = vadd.f32 %v2843_v53, %v2748_v6  ;;  %v6413_v13 = vpop.f32.mrf.mxu0 }
 0x2ee   : > { %v2720_v15 = vpop.f32.mrf.mxu1 }
 0x2ef   : > { %v2749_v16 = vadd.f32 %v2720_v15, %v2623_v52  ;;  %v2877_v17 = vadd.f32 %v5125_v57, %v2751_v11  ;;  %v6415_v18 = vpop.f32.mrf.mxu0 }
 0x2f0   : > { %v5112_v19 = vpop.f32.mrf.mxu1 }
 0x2f1   : > { %v2754_v26 = vadd.f32 %v5112_v19, %v2628_v56  ;;  %v2875_v20 = vadd.f32 %v2846_v61, %v2749_v16  ;;  %v6417_v21 = vpop.f32.mrf.mxu0 }
 0x2f2   : > { %v2733_v22 = vpop.f32.mrf.mxu1 }
 0x2f3   : > { %v6419_v14 = vadd.f32 %v2733_v22, %v2626_v60  ;;  %v5157_v23 = vpop.f32.mrf.mxu0 }
 0x2f4   : > { %v5113_v24 = vpop.f32.mrf.mxu1 }
 0x2f5   : > { %v6421_v25 = vpop.f32.mrf.mxu0 }
 0x2f6   : > { %v2736_v0 = vpop.f32.mrf.mxu1 }
 0x2f7   : > { %v6423_v27 = vpop.f32.mrf.mxu0 }
 0x2f8   : > { %v5140_v28 = vpop.f32.mrf.mxu1 }
 0x2f9   : > { %v3002_v29 = vadd.f32 %v5140_v28, %v2876_v8  ;;  %v6425_v51 = vpop.f32.mrf.mxu0  ;;  %v2629_v28 = vadd.f32 %v6399_v40, %v6403_v59  ;;  %v2878_v40 = vadd.f32 %v6409_v4, %v6419_v14 }
 0x2fa   : > { %v2969_v30 = vpop.f32.mrf.mxu1 }
 0x2fb   : > { %v3000_v31 = vadd.f32 %v2969_v30, %v2874_v12  ;;  %v6427_v32 = vpop.f32.mrf.mxu0  ;;  %v2627_v30 = vadd.f32 %v6401_v44, %v6405_v63  ;;  %v2755_v7 = vadd.f32 %v5113_v24, %v2629_v28 }
 0x2fc   : > { %v5141_v33 = vpop.f32.mrf.mxu1 }
 0x2fd   : > { %v3003_v34 = vadd.f32 %v5141_v33, %v2877_v17  ;;  %v6429_v35 = vpop.f32.mrf.mxu0  ;;  %v2881_v63 = vadd.f32 %v6411_v9, %v2755_v7 }
 0x2fe   : > { %v2972_v36 = vpop.f32.mrf.mxu1 }
 0x2ff   : > { %v3001_v37 = vadd.f32 %v2972_v36, %v2875_v20  ;;  %v5188_v38 = vpop.f32.mrf.mxu0 }
 0x300   : > { %v5144_v39 = vpop.f32.mrf.mxu1 }
 0x301   : > { %v6431_v41 = vpop.f32.mrf.mxu0  ;;  %v3127_v24 = vadd.f32 %v6421_v25, %v3001_v37 }
 0x302   : > { %v2985_v42 = vpop.f32.mrf.mxu1 }
 0x303   : > { %v5189_v43 = vpop.f32.mrf.mxu0 }
 0x304   : > { %v5145_v45 = vpop.f32.mrf.mxu1 }
 0x305   : > { %v6433_v46 = vpop.f32.mrf.mxu0 }
 0x306   : > { %v2988_v47 = vpop.f32.mrf.mxu1 }
 0x307   : > { %v6435_v48 = vpop.f32.mrf.mxu0 }
 0x308   : > { %v5172_v49 = vpop.f32.mrf.mxu1 }
 0x309   : > { %v6437_v50 = vpop.f32.mrf.mxu0 }
 0x30a   : > { %v3221_v52 = vpop.f32.mrf.mxu1 }
 0x30b   : > { %v6439_v53 = vpop.f32.mrf.mxu0 }
 0x30c   : > { %v5173_v54 = vpop.f32.mrf.mxu1 }
 0x30d   : > { %v6441_v55 = vpop.f32.mrf.mxu0 }
 0x30e   : > { %6526 = vst [vmem:[#allocation2_spill] sm:$0xff] %v6441_v55  ;;  %v3224_v56 = vpop.f32.mrf.mxu1  ;;  %v3129_v55 = vadd.f32 %v5157_v23, %v3003_v34 }
 0x30f   : > { %v6443_v57 = vpop.f32.mrf.mxu0  ;;  %v3253_v23 = vadd.f32 %v3224_v56, %v3127_v24 }
 0x310   : > { %v5176_v58 = vpop.f32.mrf.mxu1 }
 0x311   : > { %v6445_v60 = vpop.f32.mrf.mxu0 }
 0x312   : > { %v3237_v61 = vpop.f32.mrf.mxu1 }
 0x313   : > { %v6447_v62 = vpop.f32.mrf.mxu0 }
 0x314   : > { %v5177_v2 = vpop.f32.mrf.mxu1 }
 0x315   : > { %v6449_v3 = vpop.f32.mrf.mxu0 }
 0x316   : > { %6527 = vst [vmem:[#allocation3_spill] sm:$0xff] %v6449_v3  ;;  %v3240_v5 = vpop.f32.mrf.mxu1 }
 0x317   : > { %v6451_v6 = vpop.f32.mrf.mxu0 }
 0x318   : > { %6528 = vst [vmem:[#allocation4_spill] sm:$0xff] %v6451_v6  ;;  %v5204_v8 = vpop.f32.mrf.mxu1  ;;  %v2753_v6 = vadd.f32 %v2736_v0, %v2627_v30 }
 0x319   : > { %v6453_v11 = vpop.f32.mrf.mxu0 }
 0x31a   : > { %v3473_v10 = vpop.f32.mrf.mxu1  ;;  %6529 = vst [vmem:[#allocation5_spill] sm:$0xff] %v6453_v11  ;;  %v3128_v11 = vadd.f32 %v6415_v18, %v3002_v29  ;;  %v3255_v18 = vadd.f32 %v5173_v54, %v3129_v55  ;;  %v3007_v29 = vadd.f32 %v5145_v45, %v2881_v63 }
 0x31b   : > { %v6455_v16 = vpop.f32.mrf.mxu0 }
 0x31c   : > { %v5205_v12 = vpop.f32.mrf.mxu1  ;;  %6530 = vst [vmem:[#allocation6_spill] sm:$0xff] %v6455_v16  ;;  %v2880_v16 = vadd.f32 %v6407_v1, %v2754_v26  ;;  %v2879_v1 = vadd.f32 %v6413_v13, %v2753_v6  ;;  %v3004_v26 = vadd.f32 %v2985_v42, %v2878_v40  ;;  %v3133_v13 = vadd.f32 %v6427_v32, %v3007_v29 }
 0x31d   : > { %v6459_v20 = vpop.f32.mrf.mxu0  ;;  %v3379_v42 = vadd.f32 %v6433_v46, %v3253_v23 }
 0x31e   : > { %v3476_v15 = vpop.f32.mrf.mxu1  ;;  %6532 = vst [vmem:[#allocation8_spill] sm:$0xff] %v6459_v20  ;;  %v3126_v20 = vadd.f32 %v6417_v21, %v3000_v31  ;;  %v3006_v59 = vadd.f32 %v5144_v39, %v2880_v16  ;;  %v3005_v34 = vadd.f32 %v2988_v47, %v2879_v1  ;;  %v3130_v9 = vadd.f32 %v6425_v51, %v3004_v26  ;;  %v6535_v16 = vld [vmem:[#allocation2_spill] sm:$0xff] }
 0x31f   : > { %v5252_v36 = vpop.f32.mrf.mxu0  ;;  %v3259_v55 = vadd.f32 %v5177_v2, %v3133_v13  ;;  %v6534_v2 = vld [vmem:[#allocation3_spill] sm:$0xff]  ;;  %v6538_v40 = vld [vmem:[#allocation4_spill] sm:$0xff] }
 0x320   : > { %v5208_v17 = vpop.f32.mrf.mxu1  ;;  %v3252_v28 = vadd.f32 %v3221_v52, %v3126_v20  ;;  %v3132_v31 = vadd.f32 %v6423_v27, %v3006_v59  ;;  %v3131_v52 = vadd.f32 %v6429_v35, %v3005_v34  ;;  %v3256_v27 = vadd.f32 %v3237_v61, %v3130_v9 }
 0x321   : > { %v3851_v44 = vpop.f32.mrf.mxu0 }
 0x322   : > { %v6457_v19 = vpop.f32.mrf.mxu1  ;;  %v3378_v39 = vadd.f32 %v6431_v41, %v3252_v28  ;;  %v3258_v25 = vadd.f32 %v5176_v58, %v3132_v31  ;;  %v3257_v51 = vadd.f32 %v3240_v5, %v3131_v52 }
 0x323   : > { %6531 = vst [vmem:[#allocation7_spill] sm:$0xff] %v6457_v19  ;;  %v5253_v14 = vpop.f32.mrf.mxu0 }
 0x324   : > { %v6461_v22 = vpop.f32.mrf.mxu1  ;;  %v3504_v45 = vadd.f32 %v3473_v10, %v3378_v39  ;;  %v3384_v56 = vadd.f32 %v6435_v48, %v3258_v25  ;;  %v3383_v48 = vadd.f32 %v6535_v16, %v3257_v51 }
 0x325   : > { %6533 = vst [vmem:[#allocation9_spill] sm:$0xff] %v6461_v22  ;;  %v3254_v22 = vadd.f32 %v5172_v49, %v3128_v11  ;;  %v3381_v49 = vadd.f32 %v5189_v43, %v3255_v18  ;;  %v3854_v47 = vpop.f32.mrf.mxu0  ;;  %v3505_v43 = vadd.f32 %v3476_v15, %v3379_v42  ;;  %v3385_v11 = vadd.f32 %v6439_v53, %v3259_v55 }
 0x326   : > { %v6467_v33 = vpop.f32.mrf.mxu1  ;;  %v3630_v6 = vadd.f32 %v6445_v60, %v3504_v45  ;;  %v3510_v10 = vadd.f32 %v5208_v17, %v3384_v56 }
 0x327   : > { %v3380_v21 = vadd.f32 %v5188_v38, %v3254_v22  ;;  %v3507_v38 = vadd.f32 %v5205_v12, %v3381_v49  ;;  %v5256_v35 = vpop.f32.mrf.mxu0  ;;  %v3631_v12 = vadd.f32 %v6534_v2, %v3505_v43  ;;  %v3509_v17 = vadd.f32 %v6467_v33, %v3383_v48  ;;  %v4028_v2 = vld [vmem:[%s6520_s5] sm:$0xf] }
 0x328   : > { %v5236_v19 = vpop.f32.mrf.mxu1 }
 0x329   : > { %v3506_v7 = vadd.f32 %v5204_v8, %v3380_v21  ;;  %v3633_v32 = vadd.f32 %v6447_v62, %v3507_v38  ;;  %v3382_v8 = vadd.f32 %v6437_v50, %v3256_v27  ;;  %v3636_v50 = vadd.f32 %v6538_v40, %v3510_v10  ;;  %v3867_v59 = vpop.f32.mrf.mxu0 }
 0x32a   : > { %v3725_v3 = vpop.f32.mrf.mxu1  ;;  %v6536_v5 = vld [vmem:[#allocation7_spill] sm:$0xff] }
 0x32b   : > { %v3632_v41 = vadd.f32 %v6443_v57, %v3506_v7  ;;  %v3756_v57 = vadd.f32 %v3725_v3, %v3630_v6  ;;  %v3508_v20 = vadd.f32 %v6536_v5, %v3382_v8  ;;  %v6539_v3 = vld [vmem:[#allocation5_spill] sm:$0xff]  ;;  %v5257_v39 = vpop.f32.mrf.mxu0 }
 0x32c   : > { %v5237_v0 = vpop.f32.mrf.mxu1  ;;  %v6537_v60 = vld [vmem:[#allocation9_spill] sm:$0xff] }
 0x32d   : > { %v3758_v46 = vadd.f32 %v5236_v19, %v3632_v41  ;;  %v3759_v15 = vadd.f32 %v5237_v0, %v3633_v32  ;;  %v3511_v30 = vadd.f32 %v6537_v60, %v3385_v11  ;;  %v3882_v53 = vadd.f32 %v3851_v44, %v3756_v57  ;;  %v6540_v0 = vld [vmem:[#allocation6_spill] sm:$0xff]  ;;  %v3870_v38 = vpop.f32.mrf.mxu0 }
 0x32e   : > { %v3728_v4 = vpop.f32.mrf.mxu1  ;;  %v3634_v18 = vadd.f32 %v6539_v3, %v3508_v20  ;;  %v6542_v11 = vmov 0.0  }
 0x32f   : > { %v3884_v62 = vadd.f32 %v5252_v36, %v3758_v46  ;;  %v3757_v19 = vadd.f32 %v3728_v4, %v3631_v12  ;;  %v3885_v24 = vadd.f32 %v5253_v14, %v3759_v15  ;;  %v3637_v29 = vadd.f32 %v6540_v0, %v3511_v30  ;;  %v6541_v36 = vld [vmem:[#allocation8_spill] sm:$0xff]  ;;  %v4029_v12 = vld [vmem:[%s6521_s6] sm:$0xff] }
 0x330   : > { %v5240_v37 = vpop.f32.mrf.mxu1  ;;  %v3635_v34 = vadd.f32 %v6541_v36, %v3509_v17 }
 0x331   : > { %v3762_v1 = vadd.f32 %v5240_v37, %v3636_v50  ;;  %v3883_v21 = vadd.f32 %v3854_v47, %v3757_v19 }
 0x332   : > { %v3741_v54 = vpop.f32.mrf.mxu1 }
 0x333   : > { %v3760_v4 = vadd.f32 %v3741_v54, %v3634_v18  ;;  %v3888_v14 = vadd.f32 %v5256_v35, %v3762_v1 }
 0x334   : > { %v5241_v58 = vpop.f32.mrf.mxu1 }
 0x335   : > { %v3763_v33 = vadd.f32 %v5241_v58, %v3637_v29  ;;  %v3886_v27 = vadd.f32 %v3867_v59, %v3760_v4 }
 0x336   : > { %v3744_v61 = vpop.f32.mrf.mxu1 }
 0x337   : > { %v3761_v13 = vadd.f32 %v3744_v61, %v3635_v34  ;;  %v3889_v47 = vadd.f32 %v5257_v39, %v3763_v33 }
 0x338   : > { %v5268_v22 = vpop.f32.mrf.mxu1 }
 0x339   : > { %v4010_v28 = vadd.f32 %v5268_v22, %v3884_v62  ;;  %v3887_v54 = vadd.f32 %v3870_v38, %v3761_v13 }
 0x33a   : > { %v3977_v63 = vpop.f32.mrf.mxu1 }
 0x33b   : > { %v4008_v23 = vadd.f32 %v3977_v63, %v3882_v53  ;;  %v4018_v7 = vmax.f32 %v4010_v28, 0.0 }
 0x33c   : > { %v5269_v26 = vpop.f32.mrf.mxu1 }
 0x33d   : > { %v4011_v31 = vadd.f32 %v5269_v26, %v3885_v24  ;;  %v4016_v42 = vmax.f32 %v4008_v23, 0.0 }
 0x33e   : > { %v3980_v49 = vpop.f32.mrf.mxu1 }
 0x33f   : > { %v4019_v9 = vmax.f32 %v4011_v31, 0.0  ;;  %v4009_v44 = vadd.f32 %v3980_v49, %v3883_v21 }
 0x340   : > { %v5272_v25 = vpop.f32.mrf.mxu1 }
 0x341   : > { %v4025_v37 = vpack.c.bf16 %v4019_v9, %v4018_v7  ;;  %v4017_v45 = vmax.f32 %v4009_v44, 0.0  ;;  %v4014_v41 = vadd.f32 %v5272_v25, %v3888_v14 }
 0x342   : > { %v3993_v52 = vpop.f32.mrf.mxu1 }
 0x343   : > { %v4024_v55 = vpack.c.bf16 %v4017_v45, %v4016_v42  ;;  %v4012_v56 = vadd.f32 %v3993_v52, %v3886_v27  ;;  %v4022_v6 = vmax.f32 %v4014_v41, 0.0 }
 0x344   : > { %v5273_v43 = vpop.f32.mrf.mxu1 }
 0x345   : > { %v4015_v51 = vadd.f32 %v5273_v43, %v3889_v47  ;;  %v4020_v8 = vmax.f32 %v4012_v56, 0.0 }
 0x346   : > { %v3996_v58 = vpop.f32.mrf.mxu1 }
 0x347   : > { %v4023_v32 = vmax.f32 %v4015_v51, 0.0  ;;  %v4013_v46 = vadd.f32 %v3996_v58, %v3887_v54 }
 0x349   : > { %v4027_v10 = vpack.c.bf16 %v4023_v32, %v4022_v6  ;;  %v4021_v35 = vmax.f32 %v4013_v46, 0.0 }
 0x34b   : > { %v4026_v61 = vpack.c.bf16 %v4021_v35, %v4020_v8  ;;  %5275 = vmatpush3.bf16.msra.mxu0 %v4027_v10 }
 0x34c   : > { %5276 = vmatprep.subr.bf16.mxu0 %v6542_v11 }
 0x34f   : > { %5277 = vmatpush3.bf16.msra.mxu0 %v4026_v61 }
 0x350   : > { %5278 = vmatprep.subr.bf16.mxu0 %v6542_v11 }
 0x353   : > { %5279 = vmatpush3.bf16.msra.mxu0 %v4025_v37 }
 0x354   : > { %5280 = vmatprep.subr.bf16.mxu0 %v6542_v11 }
 0x357   : > { %5281 = vmatpush3.bf16.msra.mxu0 %v4024_v55 }
 0x35a   : > { %5283 = vmatmul.mubr.msk.bf16.vlgmr.msra.gmra.mxu0 %vm662_vm3, %v4028_v2 }
 0x41a   : > { %v4067_v57 = vpop.f32.mrf.mxu0 }
 0x41b   : > { %v4068_v15 = vadd.f32 %v4067_v57, %v4029_v12 }
 0x41c   : > { %v5284_v16 = vpop.f32.mrf.mxu0 }
 0x41d   : > { %4074 = vst.msk [vmem:[%s316_s24] sm:$0xff] %vm4073_vm5, %v4068_v15 }
 0x41e   : > { %v4070_v48 = vpop.f32.mrf.mxu0 }
 0x420   : > { %v5285_v5 = vpop.f32.mrf.mxu0 }
 0x421 PF: > { %s19_s27 = sadd.s32 1, %s5465_s27  }
 0x422   : > { %p16_p4 = scmp.ge.s32.totalorder %s19_s27, 4  }
 0x424   :  { %18 = sbr.rel (!%p16_p4) target bundleno = 1 (0x1), region = 116 }

</bundles_post_ra>
